<compile_context>
chip_gen: v7x
topology: tpu7x:2x2x1
jax: 0.10.0
libtpu: 0.0.40
codegen_flags: <defaults>
</compile_context>

<pallas_src>
import jax
import jax.numpy as jnp
import numpy as np
from jax.experimental import pallas as pl
from jax.experimental.pallas import tpu as pltpu

HIDDEN = 768        # hidden_size hard-coded in Labler.__init__
NUM_CLASSES = 3     # default num_classes
LANE = 128


def _round_up(x, m):
    return ((x + m - 1) // m) * m


def labler_kernel(ids_ref, mask_ref, emb_ref, wp_ref, bp_ref, wc_ref, bc_ref,
                  logits_ref, pooled_ref):
    """Fused: masked-mean (via vocab counts) -> tanh(pooler) -> classifier."""
    ids = ids_ref[...]                                   # (Bt, S) int32
    mask = mask_ref[...]                                 # (Bt, S) f32
    bt, s = ids.shape
    vocab = emb_ref.shape[0]

    # --- masked mean pooling, without ever building a (Bt, S, H) slab ---
    denom = jnp.maximum(jnp.sum(mask, axis=1, keepdims=True), 1.0)   # (Bt, 1)
    smask = mask * (1.0 / denom)                         # fold 1/denom in

    vocab_ids = jax.lax.broadcasted_iota(jnp.int32, (bt, s, vocab), 2)
    onehot = jnp.where(ids[:, :, None] == vocab_ids,
                       smask[:, :, None], 0.0)           # (Bt, S, V)
    counts = jnp.sum(onehot, axis=1)                     # (Bt, V) scaled counts

    # mean over masked tokens == scaled_counts @ emb_table   (MXU)
    mean = jnp.dot(counts, emb_ref[...],
                   preferred_element_type=jnp.float32)   # (Bt, H)

    # --- BERT-style pooler: tanh(mean @ W_pool + b_pool) ---
    pooled = jnp.tanh(
        jnp.dot(mean, wp_ref[...], preferred_element_type=jnp.float32)
        + bp_ref[...])                                   # (Bt, H)
    pooled_ref[...] = pooled

    # --- faithful Labler classifier: Linear(768, num_classes), lane-padded ---
    logits_ref[...] = (
        jnp.dot(pooled, wc_ref[...], preferred_element_type=jnp.float32)
        + bc_ref[...])                                   # (Bt, C_pad)


def labler_forward(input_ids, attention_mask, params, *, block_b=128):
    B, S = input_ids.shape
    V, H = params["emb_table"].shape
    C = params["w_cls"].shape[1]
    C_pad = _round_up(C, LANE)                           # lane-dense logits

    bt = min(block_b, _round_up(B, 8))                   # batch tile (>=8 rows)
    b_pad = _round_up(B, bt)

    ids = input_ids.astype(jnp.int32)
    mask = attention_mask.astype(jnp.float32)
    if b_pad != B:
        ids = jnp.pad(ids, ((0, b_pad - B), (0, 0)))     # padded rows: mask=0
        mask = jnp.pad(mask, ((0, b_pad - B), (0, 0)))

    w_cls = jnp.pad(params["w_cls"], ((0, 0), (0, C_pad - C)))
    b_cls = jnp.pad(params["b_cls"], ((0, 0), (0, C_pad - C)))

    logits_pad, pooled_pad = pl.pallas_call(
        labler_kernel,
        out_shape=(jax.ShapeDtypeStruct((b_pad, C_pad), jnp.float32),
                   jax.ShapeDtypeStruct((b_pad, H), jnp.float32)),
        grid=(b_pad // bt,),
        in_specs=[
            pl.BlockSpec((bt, S), lambda i: (i, 0)),      # input ids (streamed)
            pl.BlockSpec((bt, S), lambda i: (i, 0)),      # attention mask
            pl.BlockSpec((V, H), lambda i: (0, 0)),       # emb table (resident)
            pl.BlockSpec((H, H), lambda i: (0, 0)),       # pooler weight
            pl.BlockSpec((1, H), lambda i: (0, 0)),       # pooler bias
            pl.BlockSpec((H, C_pad), lambda i: (0, 0)),   # classifier weight
            pl.BlockSpec((1, C_pad), lambda i: (0, 0)),   # classifier bias
        ],
        out_specs=(pl.BlockSpec((bt, C_pad), lambda i: (i, 0)),
                   pl.BlockSpec((bt, H), lambda i: (i, 0))),
        compiler_params=pltpu.CompilerParams(
            dimension_semantics=("parallel",),            # 2 TCs on v7x
            vmem_limit_bytes=32 * 1024 * 1024),
    )(ids, mask, params["emb_table"], params["w_pool"], params["b_pool"],
      w_cls, b_cls)

    return logits_pad[:B, :C], pooled_pad[:B]


def init_params(key, vocab_size=32, hidden=HIDDEN, num_classes=NUM_CLASSES):
    k_emb, k_wp, k_bp, k_wc, k_bc = jax.random.split(key, 5)
    return {
        # TODO(synk): the real backbone transformer (`self.model`) is external
        # to Labler; it is replaced by this deterministic synthetic
        # embedding + masked-mean + tanh-pooler stand-in.
        "emb_table": jax.random.normal(k_emb, (vocab_size, hidden),
                                       jnp.float32) * 0.02,
        "w_pool": jax.random.normal(k_wp, (hidden, hidden),
                                    jnp.float32) * 0.02,
        "b_pool": jax.random.normal(k_bp, (1, hidden), jnp.float32) * 0.02,
        "w_cls": jax.random.normal(k_wc, (hidden, num_classes),
                                   jnp.float32) * 0.02,
        "b_cls": jax.random.normal(k_bc, (1, num_classes), jnp.float32) * 0.02,
    }


def reference_forward(input_ids, attention_mask, params):
    emb = params["emb_table"][input_ids].astype(jnp.float32)
    mask = attention_mask.astype(jnp.float32)
    denom = jnp.maximum(jnp.sum(mask, axis=1, keepdims=True), 1.0)
    mean = jnp.sum(emb * mask[:, :, None], axis=1) / denom
    pooled = jnp.tanh(mean @ params["w_pool"] + params["b_pool"])
    logits = pooled @ params["w_cls"] + params["b_cls"]
    return logits, pooled


if __name__ == "__main__":
    key = jax.random.PRNGKey(0)
    k_params, k_ids = jax.random.split(key)

    B, S, VOCAB = 2, 8, 32
    params = init_params(k_params, vocab_size=VOCAB)

    input_ids = jax.random.randint(k_ids, (B, S), 0, VOCAB, dtype=jnp.int32)
    attention_mask = jnp.array(
        [[1, 1, 1, 1, 1, 1, 1, 1],
         [1, 1, 1, 1, 1, 0, 0, 0]], dtype=jnp.int32)

    class_logits, pooled_output = labler_forward(input_ids, attention_mask,
                                                 params)
    jax.block_until_ready((class_logits, pooled_output))

    ref_logits, ref_pooled = reference_forward(input_ids, attention_mask,
                                               params)
    np.testing.assert_allclose(np.asarray(class_logits),
                               np.asarray(ref_logits), atol=1e-5, rtol=1e-5)
    np.testing.assert_allclose(np.asarray(pooled_output),
                               np.asarray(ref_pooled), atol=1e-5, rtol=1e-5)

    assert class_logits.shape == (B, NUM_CLASSES)
    assert pooled_output.shape == (B, HIDDEN)
    print("KERNEL_OK")
</pallas_src>

<mosaic_0001>
module attributes {stable_mosaic.version = 11 : i64} {
  func.func @labler_kernel(%arg0: i32, %arg1: memref<8x8xi32, #tpu.memory_space<vmem>>, %arg2: memref<8x8xf32, #tpu.memory_space<vmem>>, %arg3: memref<32x768xf32, #tpu.memory_space<vmem>>, %arg4: memref<768x768xf32, #tpu.memory_space<vmem>>, %arg5: memref<1x768xf32, #tpu.memory_space<vmem>>, %arg6: memref<768x128xf32, #tpu.memory_space<vmem>>, %arg7: memref<1x128xf32, #tpu.memory_space<vmem>>, %arg8: memref<8x128xf32, #tpu.memory_space<vmem>>, %arg9: memref<8x768xf32, #tpu.memory_space<vmem>>) attributes {dimension_semantics = [#tpu.dimension_semantics<parallel>], iteration_bounds = array<i64: 1>, scalar_prefetch = 0 : i64, scratch_operands = 0 : i64, tpu.core_type = #tpu.core_type<tc>, window_params = [{transform_indices = @transform_0, window_bounds = array<i64: 8, 8>}, {transform_indices = @transform_1, window_bounds = array<i64: 8, 8>}, {pipeline_mode = #tpu.pipeline_mode<synchronous>, transform_indices = @transform_2, window_bounds = array<i64: 32, 768>}, {pipeline_mode = #tpu.pipeline_mode<synchronous>, transform_indices = @transform_3, window_bounds = array<i64: 768, 768>}, {pipeline_mode = #tpu.pipeline_mode<synchronous>, transform_indices = @transform_4, window_bounds = array<i64: 1, 768>}, {pipeline_mode = #tpu.pipeline_mode<synchronous>, transform_indices = @transform_5, window_bounds = array<i64: 768, 128>}, {pipeline_mode = #tpu.pipeline_mode<synchronous>, transform_indices = @transform_6, window_bounds = array<i64: 1, 128>}, {transform_indices = @transform_7, window_bounds = array<i64: 8, 128>}, {transform_indices = @transform_8, window_bounds = array<i64: 8, 768>}]} {
    %c0 = arith.constant 0 : index
    %c0_0 = arith.constant 0 : index
    %0 = vector.load %arg1[%c0, %c0_0] : memref<8x8xi32, #tpu.memory_space<vmem>>, vector<8x8xi32>
    %c0_1 = arith.constant 0 : index
    %c0_2 = arith.constant 0 : index
    %1 = vector.load %arg2[%c0_1, %c0_2] : memref<8x8xf32, #tpu.memory_space<vmem>>, vector<8x8xf32>
    %cst = arith.constant dense<0.000000e+00> : vector<8xf32>
    %2 = vector.multi_reduction <add>, %1, %cst [1] : vector<8x8xf32> to vector<8xf32>
    %3 = vector.shape_cast %2 : vector<8xf32> to vector<8x1xf32>
    %cst_3 = arith.constant 1.000000e+00 : f32
    %4 = vector.broadcast %cst_3 : f32 to vector<8x1xf32>
    %5 = arith.maximumf %3, %4 : vector<8x1xf32>
    %cst_4 = arith.constant 1.000000e+00 : f32
    %6 = vector.broadcast %cst_4 : f32 to vector<8x1xf32>
    %7 = arith.divf %6, %5 : vector<8x1xf32>
    %8 = vector.broadcast %7 : vector<8x1xf32> to vector<8x8xf32>
    %9 = arith.mulf %1, %8 : vector<8x8xf32>
    %10 = tpu.iota {dimensions = array<i32: 2>} : vector<8x8x32xi32>
    %11 = vector.shape_cast %0 : vector<8x8xi32> to vector<8x8x1xi32>
    %12 = vector.broadcast %11 : vector<8x8x1xi32> to vector<8x8x32xi32>
    %13 = arith.cmpi eq, %12, %10 : vector<8x8x32xi32>
    %14 = vector.shape_cast %9 : vector<8x8xf32> to vector<8x8x1xf32>
    %cst_5 = arith.constant 0.000000e+00 : f32
    %15 = vector.shape_cast %14 : vector<8x8x1xf32> to vector<8x8x1xf32>
    %16 = vector.broadcast %15 : vector<8x8x1xf32> to vector<8x8x32xf32>
    %17 = vector.broadcast %cst_5 : f32 to vector<8x8x32xf32>
    %18 = arith.select %13, %16, %17 : vector<8x8x32xi1>, vector<8x8x32xf32>
    %cst_6 = arith.constant dense<0.000000e+00> : vector<8x32xf32>
    %19 = vector.multi_reduction <add>, %18, %cst_6 [1] : vector<8x8x32xf32> to vector<8x32xf32>
    %c0_7 = arith.constant 0 : index
    %c0_8 = arith.constant 0 : index
    %20 = vector.load %arg3[%c0_7, %c0_8] : memref<32x768xf32, #tpu.memory_space<vmem>>, vector<32x768xf32>
    %cst_9 = arith.constant dense<0.000000e+00> : vector<8x768xf32>
    %21 = tpu.matmul %19, %20, %cst_9 {dimension_numbers = #tpu.dot_dimension_numbers<[1], [0], [0], [1], [0, 0, 1, 1], [], []>} : vector<8x32xf32>, vector<32x768xf32>, vector<8x768xf32> -> vector<8x768xf32>
    %c0_10 = arith.constant 0 : index
    %c0_11 = arith.constant 0 : index
    %22 = vector.load %arg4[%c0_10, %c0_11] : memref<768x768xf32, #tpu.memory_space<vmem>>, vector<768x768xf32>
    %cst_12 = arith.constant dense<0.000000e+00> : vector<8x768xf32>
    %23 = tpu.matmul %21, %22, %cst_12 {dimension_numbers = #tpu.dot_dimension_numbers<[1], [0], [0], [1], [0, 0, 1, 1], [], []>} : vector<8x768xf32>, vector<768x768xf32>, vector<8x768xf32> -> vector<8x768xf32>
    %c0_13 = arith.constant 0 : index
    %c0_14 = arith.constant 0 : index
    %24 = vector.load %arg5[%c0_13, %c0_14] : memref<1x768xf32, #tpu.memory_space<vmem>>, vector<1x768xf32>
    %25 = vector.broadcast %24 : vector<1x768xf32> to vector<8x768xf32>
    %26 = arith.addf %23, %25 : vector<8x768xf32>
    %27 = math.tanh %26 : vector<8x768xf32>
    %c0_15 = arith.constant 0 : index
    %c0_16 = arith.constant 0 : index
    %28 = vector.load %arg9[%c0_15, %c0_16] : memref<8x768xf32, #tpu.memory_space<vmem>>, vector<8x768xf32>
    tpu.vector_store %arg9[%c0_15, %c0_16], %27 {strides = array<i32>} : memref<8x768xf32, #tpu.memory_space<vmem>>, vector<8x768xf32>,
    %c0_17 = arith.constant 0 : index
    %c0_18 = arith.constant 0 : index
    %29 = vector.load %arg6[%c0_17, %c0_18] : memref<768x128xf32, #tpu.memory_space<vmem>>, vector<768x128xf32>
    %cst_19 = arith.constant dense<0.000000e+00> : vector<8x128xf32>
    %30 = tpu.matmul %27, %29, %cst_19 {dimension_numbers = #tpu.dot_dimension_numbers<[1], [0], [0], [1], [0, 0, 1, 1], [], []>} : vector<8x768xf32>, vector<768x128xf32>, vector<8x128xf32> -> vector<8x128xf32>
    %c0_20 = arith.constant 0 : index
    %c0_21 = arith.constant 0 : index
    %31 = vector.load %arg7[%c0_20, %c0_21] : memref<1x128xf32, #tpu.memory_space<vmem>>, vector<1x128xf32>
    %32 = vector.broadcast %31 : vector<1x128xf32> to vector<8x128xf32>
    %33 = arith.addf %30, %32 : vector<8x128xf32>
    %c0_22 = arith.constant 0 : index
    %c0_23 = arith.constant 0 : index
    %34 = vector.load %arg8[%c0_22, %c0_23] : memref<8x128xf32, #tpu.memory_space<vmem>>, vector<8x128xf32>
    tpu.vector_store %arg8[%c0_22, %c0_23], %33 {strides = array<i32>} : memref<8x128xf32, #tpu.memory_space<vmem>>, vector<8x128xf32>,
    return
  }
  func.func @transform_0(%arg0: i32) -> (i32, i32) {
    %c0_i32 = arith.constant 0 : i32
    %c0_i32_0 = arith.constant 0 : i32
    return %arg0, %c0_i32 : i32, i32
  }
  func.func @transform_1(%arg0: i32) -> (i32, i32) {
    %c0_i32 = arith.constant 0 : i32
    %c0_i32_0 = arith.constant 0 : i32
    return %arg0, %c0_i32 : i32, i32
  }
  func.func @transform_2(%arg0: i32) -> (i32, i32) {
    %c0_i32 = arith.constant 0 : i32
    %c0_i32_0 = arith.constant 0 : i32
    %c0_i32_1 = arith.constant 0 : i32
    return %c0_i32, %c0_i32_0 : i32, i32
  }
  func.func @transform_3(%arg0: i32) -> (i32, i32) {
    %c0_i32 = arith.constant 0 : i32
    %c0_i32_0 = arith.constant 0 : i32
    %c0_i32_1 = arith.constant 0 : i32
    return %c0_i32, %c0_i32_0 : i32, i32
  }
  func.func @transform_4(%arg0: i32) -> (i32, i32) {
    %c0_i32 = arith.constant 0 : i32
    %c0_i32_0 = arith.constant 0 : i32
    %c0_i32_1 = arith.constant 0 : i32
    return %c0_i32, %c0_i32_0 : i32, i32
  }
  func.func @transform_5(%arg0: i32) -> (i32, i32) {
    %c0_i32 = arith.constant 0 : i32
    %c0_i32_0 = arith.constant 0 : i32
    %c0_i32_1 = arith.constant 0 : i32
    return %c0_i32, %c0_i32_0 : i32, i32
  }
  func.func @transform_6(%arg0: i32) -> (i32, i32) {
    %c0_i32 = arith.constant 0 : i32
    %c0_i32_0 = arith.constant 0 : i32
    %c0_i32_1 = arith.constant 0 : i32
    return %c0_i32, %c0_i32_0 : i32, i32
  }
  func.func @transform_7(%arg0: i32) -> (i32, i32) {
    %c0_i32 = arith.constant 0 : i32
    %c0_i32_0 = arith.constant 0 : i32
    return %arg0, %c0_i32 : i32, i32
  }
  func.func @transform_8(%arg0: i32) -> (i32, i32) {
    %c0_i32 = arith.constant 0 : i32
    %c0_i32_0 = arith.constant 0 : i32
    return %arg0, %c0_i32 : i32, i32
  }
}

</mosaic_0001>

<bundles_post_ra>
// kernel: tpu_custom_call.1
= control target key start
LH: loop header
LB: loop body
LE: loop exit
PB: predicated region body
PF: predicated region fallthrough
CT: control target
= control target key end

     0   :  { %14 = vsyncpa [#allocation3], 0  ;;  %s3504_s0 = inlined_call_operand.hbm [shape: s32[8,8], index: 0, kind: input, shape index: {}]   ;;  %s3505_s1 = inlined_call_operand.hbm [shape: f32[8,8], index: 1, kind: input, shape index: {}]   ;;  %s3506_s2 = inlined_call_operand.hbm [shape: f32[32,768], index: 2, kind: input, shape index: {}]   ;;  %s3507_s3 = inlined_call_operand.hbm [shape: f32[768,768], index: 3, kind: input, shape index: {}]   ;;  %s3508_s4 = inlined_call_operand.hbm [shape: f32[1,768], index: 4, kind: input, shape index: {}]   ;;  %s3509_s5 = inlined_call_operand.hbm [shape: f32[768,128], index: 5, kind: input, shape index: {}]   ;;  %s3510_s6 = inlined_call_operand.hbm [shape: f32[1,128], index: 6, kind: input, shape index: {}]   ;;  %s3511_s7 = inlined_call_operand.hbm [shape: f32[8,128], index: 7, kind: output, shape index: {0}]   ;;  %s3512_s8 = inlined_call_operand.hbm [shape: f32[8,768], index: 8, kind: output, shape index: {1}]  }
   0x1   :  { %15 = vsyncpa [#allocation6], 0 }
   0x2   :  { %16 = vsyncpa [#allocation9], 0 }
   0x3   :  { %17 = vsyncpa [#allocation12], 0 }
   0x4   :  { %18 = vsyncpa [#allocation4], 0 }
   0x5   :  { %19 = vsyncpa [#allocation16], 0  ;;  %s3241_s27 = smov [#allocation5]   ;;  %s3031_s9 = scalar_lea.hbm %s3505_s1, 128 }
   0x6   :  { %s36_s28 = sshll.u32 %s3241_s27, 4  ;;  %p3032_p0 = scmp.ne.s32.totalorder %s3505_s1, %s3031_s9  ;;  %s37_s28 = int_to_ptr.vmem [resolvable:$true] %s36_s28 }
   0x7   :  { %p3035_p1 = scmp.lt.u32.totalorder %s3031_s9, %s3505_s1 }
   0x9   :  { %p3037_p2 = pnand %p3035_p1, %p3032_p0 }
   0xb   :  { %3040 = shalt.err (!%p3037_p2)
}
   0xc   :  { %s3041_s14 = scalar_lea.vmem %s37_s28, 128  ;;  %p3046_p4 = scmp.lt.s32.totalorder %s37_s28, %s37_s28 }
   0xd   :  { %p3042_p3 = scmp.ne.s32.totalorder %s37_s28, %s3041_s14  ;;  %p3047_p5 = scmp.lt.s32.totalorder %s3041_s14, %s3041_s14 }
   0xf   :  { %p3048_p6 = por %p3047_p5, %p3046_p4 }
  0x11   :  { %p3049_p7 = pnand %p3048_p6, %p3042_p3 }
  0x13   :  { %3052 = shalt.err (!%p3049_p7)
}
  0x14   :  { %39 = dma.hbm_to_vmem [thread:$0]  %s3505_s1, 128, %s37_s28, [#allocation6]  }
  0x15   :  { %s3242_s17 = smov [#allocation8]   ;;  %s3243_s19 = smov [#allocation11]  }
  0x16   :  { %s57_s18 = sshll.u32 %s3242_s17, 4  ;;  %s79_s20 = sshll.u32 %s3243_s19, 4  ;;  %s58_s18 = int_to_ptr.vmem [resolvable:$true] %s57_s18  ;;  %s80_s20 = int_to_ptr.vmem [resolvable:$true] %s79_s20 }
  0x17   :  { %s3053_s23 = scalar_lea.hbm %s3507_s3, 73728 }
  0x18   :  { %p3054_p8 = scmp.ne.s32.totalorder %s3507_s3, %s3053_s23  ;;  %p3057_p9 = scmp.lt.u32.totalorder %s3053_s23, %s3507_s3 }
  0x1a   :  { %p3059_p10 = pnand %p3057_p9, %p3054_p8 }
  0x1c   :  { %3062 = shalt.err (!%p3059_p10)
}
  0x1d   :  { %s3063_s1 = scalar_lea.vmem %s58_s18, 73728  ;;  %p3068_p12 = scmp.lt.s32.totalorder %s58_s18, %s58_s18 }
  0x1e   :  { %p3064_p11 = scmp.ne.s32.totalorder %s58_s18, %s3063_s1  ;;  %p3069_p13 = scmp.lt.s32.totalorder %s3063_s1, %s3063_s1 }
  0x20   :  { %p3070_p0 = por %p3069_p13, %p3068_p12 }
  0x22   :  { %p3071_p1 = pnand %p3070_p0, %p3064_p11 }
  0x24   :  { %3074 = shalt.err (!%p3071_p1)
}
  0x25   :  { %s3244_s28 = smov 768   ;;  %s3245_s29 = smov 48  }
  0x26   :  { %63 = dma.hbm_to_vmem [thread:$0]  %s3507_s3, 73728, %s58_s18, [#allocation9], %s3244_s28, %s3244_s28, %s3245_s29  }
  0x27   :  { %s3075_s12 = scalar_lea.hbm %s3509_s5, 12288 }
  0x28   :  { %p3076_p2 = scmp.ne.s32.totalorder %s3509_s5, %s3075_s12  ;;  %p3079_p3 = scmp.lt.u32.totalorder %s3075_s12, %s3509_s5 }
  0x2a   :  { %p3081_p4 = pnand %p3079_p3, %p3076_p2 }
  0x2c   :  { %3084 = shalt.err (!%p3081_p4)
}
  0x2d   :  { %s3085_s17 = scalar_lea.vmem %s80_s20, 12288  ;;  %p3090_p6 = scmp.lt.s32.totalorder %s80_s20, %s80_s20 }
  0x2e   :  { %p3086_p5 = scmp.ne.s32.totalorder %s80_s20, %s3085_s17  ;;  %p3091_p7 = scmp.lt.s32.totalorder %s3085_s17, %s3085_s17 }
  0x30   :  { %p3092_p8 = por %p3091_p7, %p3090_p6 }
  0x32   :  { %p3093_p9 = pnand %p3092_p8, %p3086_p5 }
  0x34   :  { %3096 = shalt.err (!%p3093_p9)
}
  0x35   :  { %s3246_s3 = smov 128   ;;  %s3247_s18 = smov 8  }
  0x36   :  { %85 = dma.hbm_to_vmem [thread:$0]  %s3509_s5, 12288, %s80_s20, [#allocation12], %s3246_s3, %s3246_s3, %s3247_s18  }
  0x37   :  { %s3248_s22 = smov [#allocation2]   ;;  %s3249_s24 = smov [#allocation7]  }
  0x38   :  { %s26_s23 = sshll.u32 %s3248_s22, 4  ;;  %s45_s25 = sshll.u32 %s3249_s24, 4  ;;  %s27_s23 = int_to_ptr.vmem [resolvable:$true] %s26_s23  ;;  %s46_s25 = int_to_ptr.vmem [resolvable:$true] %s45_s25 }
  0x39   :  { %s3097_s1 = scalar_lea.hbm %s3504_s0, 128 }
  0x3a   :  { %p3098_p10 = scmp.ne.s32.totalorder %s3504_s0, %s3097_s1  ;;  %p3101_p11 = scmp.lt.u32.totalorder %s3097_s1, %s3504_s0 }
  0x3c   :  { %p3103_p12 = pnand %p3101_p11, %p3098_p10 }
  0x3e   :  { %3106 = shalt.err (!%p3103_p12)
}
  0x3f   :  { %s3107_s5 = scalar_lea.vmem %s27_s23, 128  ;;  %p3112_p0 = scmp.lt.s32.totalorder %s27_s23, %s27_s23 }
  0x40   :  { %p3108_p13 = scmp.ne.s32.totalorder %s27_s23, %s3107_s5  ;;  %p3113_p1 = scmp.lt.s32.totalorder %s3107_s5, %s3107_s5 }
  0x42   :  { %p3114_p2 = por %p3113_p1, %p3112_p0 }
  0x44   :  { %p3115_p3 = pnand %p3114_p2, %p3108_p13 }
  0x46   :  { %3118 = shalt.err (!%p3115_p3)
}
  0x47   :  { %29 = dma.hbm_to_vmem [thread:$0]  %s3504_s0, 128, %s27_s23, [#allocation3]  }
  0x48   :  { %s3119_s15 = scalar_lea.hbm %s3506_s2, 3072 }
  0x49   :  { %p3120_p4 = scmp.ne.s32.totalorder %s3506_s2, %s3119_s15  ;;  %p3123_p5 = scmp.lt.u32.totalorder %s3119_s15, %s3506_s2 }
  0x4b   :  { %p3125_p6 = pnand %p3123_p5, %p3120_p4 }
  0x4d   :  { %3128 = shalt.err (!%p3125_p6)
}
  0x4e   :  { %s3129_s19 = scalar_lea.vmem %s46_s25, 3072  ;;  %p3134_p8 = scmp.lt.s32.totalorder %s46_s25, %s46_s25 }
  0x4f   :  { %p3130_p7 = scmp.ne.s32.totalorder %s46_s25, %s3129_s19  ;;  %p3135_p9 = scmp.lt.s32.totalorder %s3129_s19, %s3129_s19 }
  0x51   :  { %p3136_p10 = por %p3135_p9, %p3134_p8 }
  0x53   :  { %p3137_p11 = pnand %p3136_p10, %p3130_p7 }
  0x55   :  { %3140 = shalt.err (!%p3137_p11)
}
  0x56   :  { %51 = dma.hbm_to_vmem [thread:$0]  %s3506_s2, 3072, %s46_s25, [#allocation6], %s3244_s28, %s3244_s28, %s3245_s29  }
  0x57   :  { %s3250_s22 = smov [#allocation10]   ;;  %s3251_s24 = smov [#allocation13]  }
  0x58   :  { %s70_s23 = sshll.u32 %s3250_s22, 4  ;;  %s92_s26 = sshll.u32 %s3251_s24, 4  ;;  %s71_s23 = int_to_ptr.vmem [resolvable:$true] %s70_s23  ;;  %s93_s26 = int_to_ptr.vmem [resolvable:$true] %s92_s26 }
  0x59   :  { %s3141_s30 = scalar_lea.hbm %s3508_s4, 96 }
  0x5a   :  { %p3142_p12 = scmp.ne.s32.totalorder %s3508_s4, %s3141_s30  ;;  %p3145_p13 = scmp.lt.u32.totalorder %s3141_s30, %s3508_s4 }
  0x5c   :  { %p3147_p0 = pnand %p3145_p13, %p3142_p12 }
  0x5e   :  { %3150 = shalt.err (!%p3147_p0)
}
  0x5f   :  { %s3151_s2 = scalar_lea.vmem %s71_s23, 96  ;;  %p3156_p2 = scmp.lt.s32.totalorder %s71_s23, %s71_s23 }
  0x60   :  { %p3152_p1 = scmp.ne.s32.totalorder %s71_s23, %s3151_s2  ;;  %p3157_p3 = scmp.lt.s32.totalorder %s3151_s2, %s3151_s2 }
  0x62   :  { %p3158_p4 = por %p3157_p3, %p3156_p2 }
  0x64   :  { %p3159_p5 = pnand %p3158_p4, %p3152_p1 }
  0x66   :  { %3162 = shalt.err (!%p3159_p5)
}
  0x67   :  { %73 = dma.hbm_to_vmem [thread:$0]  %s3508_s4, 96, %s71_s23, [#allocation9]  }
  0x68   :  { %s3163_s12 = scalar_lea.hbm %s3510_s6, 16 }
  0x69   :  { %p3164_p6 = scmp.ne.s32.totalorder %s3510_s6, %s3163_s12  ;;  %p3167_p7 = scmp.lt.u32.totalorder %s3163_s12, %s3510_s6 }
  0x6b   :  { %p3169_p8 = pnand %p3167_p7, %p3164_p6 }
  0x6d   :  { %3172 = shalt.err (!%p3169_p8)
}
  0x6e   :  { %s3173_s17 = scalar_lea.vmem %s93_s26, 16  ;;  %s3177_s3 = scalar_lea.vmem %s93_s26, 32 }
  0x6f   :  { %p3174_p9 = scmp.ne.s32.totalorder %s93_s26, %s3173_s17  ;;  %p3178_p10 = scmp.lt.s32.totalorder %s93_s26, %s93_s26 }
  0x70   :  { %p3179_p11 = scmp.lt.s32.totalorder %s3177_s3, %s3173_s17 }
  0x72   :  { %p3180_p12 = por %p3179_p11, %p3178_p10 }
  0x74   :  { %p3181_p13 = pnand %p3180_p12, %p3174_p9 }
  0x76   :  { %3184 = shalt.err (!%p3181_p13)
}
  0x77   :  { %95 = dma.hbm_to_vmem [thread:$0]  %s3510_s6, 16, %s93_s26, [#allocation12]  }
  0x78   :  { %3229 = dma.done.wait [#allocation3], 128  }
  0x79   :  { %3230 = vsyncadd [#allocation3], 4294967168 }
  0x7a   :  { %3231 = dma.done.wait [#allocation6], 3200  }
  0x7b   :  { %3232 = vsyncadd [#allocation6], 4294964096 }
  0x7c   :  { %3233 = dma.done.wait [#allocation9], 73824  }
  0x7d   :  { %3234 = vsyncadd [#allocation9], 4294893472 }
  0x7e   :  { %3235 = dma.done.wait [#allocation12], 12304  }
  0x7f   :  { %3236 = vsyncadd [#allocation12], 4294954992  ;;  %v127_v0 = vlaneseq  ;;  %vm119_vm0 = vcmask 64512   ;;  %v118_v4 = vld [vmem:[#allocation5] sm:$0xff]  ;;  %v117_v5 = vld [vmem:[#allocation2] sm:$0xff]  ;;  %v3252_v48 = vmov 0.0  }
  0x80   :  { %v120_v6 = vsel %vm119_vm0, %v118_v4, 0.0  ;;  %v315_v31 = vld [vmem:[#allocation7 + $0x8] sm:$0xff]  ;;  %v321_v32 = vld [vmem:[#allocation7 + $0x38] sm:$0xff]  ;;  %v314_v35 = vld [vmem:[#allocation7] sm:$0xff]  ;;  %426 = vmatprep.mubr.f32.mxu1 %v3252_v48  ;;  %vm257_vm2 = vcmask 261120   ;;  %vm346_vm10 = vcmask 1041409  }
  0x81   :  { %v130_v1 = vshrl.u32 %v127_v0, 7  ;;  %121 = vadd.xlane.f32.xlu0 %v120_v6  ;;  %v2289_v34 = vpack.c.bf16 %v321_v32, %v315_v31  ;;  %v320_v36 = vld [vmem:[#allocation7 + $0x30] sm:$0xff]  ;;  %v327_v38 = vld [vmem:[#allocation7 + $0x68] sm:$0xff]  ;;  %v333_v39 = vld [vmem:[#allocation7 + $0x98] sm:$0xff]  ;;  %vm348_vm11 = vcmask 1042434   ;;  %vm350_vm12 = vcmask 1043459  }
  0x82   :  { %v2291_v37 = vpack.c.bf16 %v320_v36, %v314_v35  ;;  %v2293_v41 = vpack.c.bf16 %v333_v39, %v327_v38  ;;  %v326_v42 = vld [vmem:[#allocation7 + $0x60] sm:$0xff]  ;;  %v332_v43 = vld [vmem:[#allocation7 + $0x90] sm:$0xff]  ;;  %v317_v45 = vld [vmem:[#allocation7 + $0x18] sm:$0xff]  ;;  %vm352_vm13 = vcmask 1044484   ;;  %vm354_vm14 = vcmask 1045509   ;;  %s3253_s6 = smov [#allocation15]  }
  0x83   :  { %v3391_v2 = vsub.s32 1, %v130_v1  ;;  %v3393_v3 = vsub.s32 2, %v130_v1  ;;  %v3397_v9 = vsub.s32 3, %v130_v1  ;;  %v3400_v11 = vsub.s32 4, %v130_v1  ;;  %2290 = vmatprep.subr.bf16.mxu1 %v2289_v34  ;;  %v323_v46 = vld [vmem:[#allocation7 + $0x48] sm:$0xff]  ;;  %v582_v50 = vld [vmem:[#allocation8 + $0x38] sm:$0xff] }
  0x84   :  { %v3403_v13 = vsub.s32 5, %v130_v1  ;;  %v173_v15 = vsub.s32 6, %v130_v1  ;;  %v3406_v16 = vsub.s32 0, %v130_v1  ;;  %v180_v19 = vsub.s32 7, %v130_v1  ;;  %2292 = vmatpush1.bf16.msra.mxu1 %v2291_v37  ;;  %v576_v49 = vld [vmem:[#allocation8 + $0x8] sm:$0xff]  ;;  %v575_v51 = vld [vmem:[#allocation8] sm:$0xff] }
  0x85   :  { %v139_v7 = vrot.slane %v117_v5, %v3391_v2  ;;  %v146_v8 = vrot.slane %v117_v5, %v3393_v3  ;;  %v153_v10 = vrot.slane %v117_v5, %v3397_v9  ;;  %v160_v12 = vrot.slane %v117_v5, %v3400_v11  ;;  %2294 = vmatprep.subr.bf16.mxu1 %v2293_v41  ;;  %v581_v53 = vld [vmem:[#allocation8 + $0x30] sm:$0xff]  ;;  %v588_v54 = vld [vmem:[#allocation8 + $0x68] sm:$0xff]  ;;  %v594_v55 = vld [vmem:[#allocation8 + $0x98] sm:$0xff]  ;;  %s2164_s19 = sshll.u32 %s3253_s6, 4  ;;  %s2165_s19 = int_to_ptr.vmem [resolvable:$true] %s2164_s19 }
  0x86   :  { %v167_v14 = vrot.slane %v117_v5, %v3403_v13  ;;  %v174_v17 = vrot.slane %v117_v5, %v173_v15  ;;  %v132_v18 = vrot.slane %v117_v5, %v3406_v16  ;;  %v181_v20 = vrot.slane %v117_v5, %v180_v19  ;;  %v587_v58 = vld [vmem:[#allocation8 + $0x60] sm:$0xff]  ;;  %v593_v59 = vld [vmem:[#allocation8 + $0x90] sm:$0xff]  ;;  %v600_v60 = vld [vmem:[#allocation8 + $0xc8] sm:$0xff]  ;;  %s3185_s0 = scalar_lea.vmem %s2165_s19, 768  ;;  %p3190_p1 = scmp.lt.s32.totalorder %s2165_s19, %s2165_s19 }
  0x87   :  { %141 = vbcast.lane.b32.xlu1 %v139_v7, 256  ;;  %v2295_v44 = vpack.c.bf16 %v332_v43, %v326_v42  ;;  %v2297_v47 = vpack.c.bf16 %v323_v46, %v317_v45  ;;  %v2313_v52 = vpack.c.bf16 %v582_v50, %v576_v49  ;;  %v2315_v56 = vpack.c.bf16 %v581_v53, %v575_v51  ;;  %v606_v61 = vld [vmem:[#allocation8 + $0xf8] sm:$0xff]  ;;  %v599_v1 = vld [vmem:[#allocation8 + $0xc0] sm:$0xff]  ;;  %v612_v5 = vld [vmem:[#allocation8 + $0x128] sm:$0xff]  ;;  %p3186_p0 = scmp.ne.s32.totalorder %s2165_s19, %s3185_s0  ;;  %p3191_p2 = scmp.lt.s32.totalorder %s3185_s0, %s3185_s0 }
  0x88   :  { %v2317_v57 = vpack.c.bf16 %v594_v55, %v588_v54  ;;  %v2319_v62 = vpack.c.bf16 %v593_v59, %v587_v58  ;;  %v2321_v63 = vpack.c.bf16 %v606_v61, %v600_v60  ;;  %v618_v6 = vld [vmem:[#allocation8 + $0x158] sm:$0xff]  ;;  %v647_v31 = vld [vmem:[#allocation8 + $0x240] sm:$0xff]  ;;  %v653_v32 = vld [vmem:[#allocation8 + $0x270] sm:$0xff]  ;;  %vm356_vm15 = vcmask 1046534  }
  0x89   :  { %2296 = vmatpush1.bf16.msra.mxu1 %v2295_v44  ;;  %2314 = vmatprep.subr.bf16.mxu0 %v2313_v52  ;;  %v666_v34 = vld [vmem:[#allocation8 + $0x2d8] sm:$0xff]  ;;  %v2339_v35 = vpack.c.bf16 %v653_v32, %v647_v31  ;;  %v659_v37 = vld [vmem:[#allocation8 + $0x2a0] sm:$0xff]  ;;  %v665_v38 = vld [vmem:[#allocation8 + $0x2d0] sm:$0xff]  ;;  %vm358_vm0 = vcmask 1047559   ;;  %p3192_p3 = por %p3191_p2, %p3190_p1 }
  0x8a   :  { %2298 = vmatprep.subr.bf16.mxu1 %v2297_v47  ;;  %2316 = vmatpush1.bf16.msra.mxu0 %v2315_v56  ;;  %v672_v39 = vld [vmem:[#allocation8 + $0x308] sm:$0xff]  ;;  %v2343_v41 = vpack.c.bf16 %v665_v38, %v659_v37  ;;  %v671_v43 = vld [vmem:[#allocation8 + $0x300] sm:$0xff]  ;;  %v677_v44 = vld [vmem:[#allocation8 + $0x330] sm:$0xff] }
  0x8b   :  { %148 = vbcast.lane.b32.xlu1 %v146_v8, 256  ;;  %2318 = vmatprep.subr.bf16.mxu0 %v2317_v57  ;;  %v2325_v8 = vpack.c.bf16 %v618_v6, %v612_v5  ;;  %v684_v45 = vld [vmem:[#allocation8 + $0x368] sm:$0xff]  ;;  %v690_v46 = vld [vmem:[#allocation8 + $0x398] sm:$0xff]  ;;  %v2347_v47 = vpack.c.bf16 %v677_v44, %v671_v43  ;;  %v683_v50 = vld [vmem:[#allocation8 + $0x360] sm:$0xff]  ;;  %p3193_p4 = pnand %p3192_p3, %p3186_p0 }
  0x8c   :  { %v2349_v49 = vpack.c.bf16 %v690_v46, %v684_v45  ;;  %v689_v51 = vld [vmem:[#allocation8 + $0x390] sm:$0xff]  ;;  %v696_v52 = vld [vmem:[#allocation8 + $0x3c8] sm:$0xff]  ;;  %v702_v53 = vld [vmem:[#allocation8 + $0x3f8] sm:$0xff] }
  0x8d   :  { %v2351_v54 = vpack.c.bf16 %v689_v51, %v683_v50  ;;  %v2353_v55 = vpack.c.bf16 %v702_v53, %v696_v52  ;;  %v695_v56 = vld [vmem:[#allocation8 + $0x3c0] sm:$0xff]  ;;  %v701_v57 = vld [vmem:[#allocation8 + $0x3f0] sm:$0xff]  ;;  %v708_v58 = vld [vmem:[#allocation8 + $0x428] sm:$0xff] }
  0x8e   :  { %2320 = vmatpush1.bf16.msra.mxu0 %v2319_v62  ;;  %v714_v59 = vld [vmem:[#allocation8 + $0x458] sm:$0xff]  ;;  %v2355_v60 = vpack.c.bf16 %v701_v57, %v695_v56  ;;  %v707_v62 = vld [vmem:[#allocation8 + $0x420] sm:$0xff] }
  0x8f   :  { %155 = vbcast.lane.b32.xlu1 %v153_v10, 256  ;;  %2322 = vmatprep.subr.bf16.mxu0 %v2321_v63  ;;  %v611_v10 = vld [vmem:[#allocation8 + $0x120] sm:$0xff]  ;;  %v2357_v61 = vpack.c.bf16 %v714_v59, %v708_v58  ;;  %v713_v63 = vld [vmem:[#allocation8 + $0x450] sm:$0xff] }
  0x90   :  { %v2359_v6 = vpack.c.bf16 %v713_v63, %v707_v62  ;;  %v755_v32 = vld [vmem:[#allocation8 + $0x5a0] sm:$0xff] }
  0x93   :  { %162 = vbcast.lane.b32.xlu1 %v160_v12, 256  ;;  %v617_v12 = vld [vmem:[#allocation8 + $0x150] sm:$0xff] }
  0x97   :  { %169 = vbcast.lane.b32.xlu1 %v167_v14, 256  ;;  %134 = vbcast.lane.b32.xlu0 %v132_v18, 256  ;;  %v624_v14 = vld [vmem:[#allocation8 + $0x188] sm:$0xff] }
  0x9b   :  { %176 = vbcast.lane.b32.xlu1 %v174_v17, 256  ;;  %v2327_v17 = vpack.c.bf16 %v617_v12, %v611_v10  ;;  %v725_v10 = vld [vmem:[#allocation8 + $0x4b0] sm:$0xff]  ;;  %v732_v12 = vld [vmem:[#allocation8 + $0x4e8] sm:$0xff] }
  0xf9   :  { %v142_v5 = vpop.permute.xlu1 %141 }
 0x10e   :  { %v122_v21 = vpop.xlane.xlu0 %121 }
 0x10f   :  { %v123_v22 = vmax.f32 %v122_v21, 1.0  ;;  %v636_v21 = vld [vmem:[#allocation8 + $0x1e8] sm:$0xff] }
 0x111   :  { %3017 = vrcp.f32 %v123_v22  ;;  %v642_v22 = vld [vmem:[#allocation8 + $0x218] sm:$0xff] }
 0x112   :  { %v135_v38 = vpop.permute.xlu0 %134 }
 0x11b   :  { %v3018_v23 = vpop.eup %3017 }
 0x11c   :  { %v126_v24 = vmul.f32 %v3018_v23, %v118_v4  ;;  %v605_v4 = vld [vmem:[#allocation8 + $0xf0] sm:$0xff] }
 0x11d   :  { %v2323_v7 = vpack.c.bf16 %v605_v4, %v599_v1  ;;  %v720_v1 = vld [vmem:[#allocation8 + $0x488] sm:$0xff]  ;;  %v726_v4 = vld [vmem:[#allocation8 + $0x4b8] sm:$0xff] }
 0x11e   :  { %v196_v25 = vrot.slane %v126_v24, %v3406_v16  ;;  %v217_v26 = vrot.slane %v126_v24, %v3397_v9  ;;  %v203_v27 = vrot.slane %v126_v24, %v3391_v2  ;;  %v224_v28 = vrot.slane %v126_v24, %v3400_v11 }
 0x11f   :  { %v210_v29 = vrot.slane %v126_v24, %v3393_v3  ;;  %v231_v30 = vrot.slane %v126_v24, %v3403_v13  ;;  %v238_v33 = vrot.slane %v126_v24, %v173_v15  ;;  %v245_v40 = vrot.slane %v126_v24, %v180_v19  ;;  %v630_v15 = vld [vmem:[#allocation8 + $0x1b8] sm:$0xff]  ;;  %2324 = vmatpush1.bf16.msra.mxu0 %v2323_v7  ;;  %v623_v19 = vld [vmem:[#allocation8 + $0x180] sm:$0xff] }
 0x120   :  { %198 = vbcast.lane.b32.xlu1 %v196_v25, 256  ;;  %219 = vbcast.lane.b32.xlu0 %v217_v26, 256  ;;  %v2329_v18 = vpack.c.bf16 %v630_v15, %v624_v14  ;;  %v2333_v24 = vpack.c.bf16 %v642_v22, %v636_v21  ;;  %v635_v25 = vld [vmem:[#allocation8 + $0x1e0] sm:$0xff]  ;;  %v641_v26 = vld [vmem:[#allocation8 + $0x210] sm:$0xff]  ;;  %v2361_v7 = vpack.c.bf16 %v726_v4, %v720_v1  ;;  %v738_v14 = vld [vmem:[#allocation8 + $0x518] sm:$0xff] }
 0x121   :  { %2326 = vmatprep.subr.bf16.mxu0 %v2325_v8  ;;  %v719_v8 = vld [vmem:[#allocation8 + $0x480] sm:$0xff]  ;;  %v744_v21 = vld [vmem:[#allocation8 + $0x548] sm:$0xff]  ;;  %v750_v22 = vld [vmem:[#allocation8 + $0x578] sm:$0xff] }
 0x122   :  { %v2363_v15 = vpack.c.bf16 %v725_v10, %v719_v8 }
 0x123   :  { %2328 = vmatpush1.bf16.msra.mxu0 %v2327_v17  ;;  %v2365_v17 = vpack.c.bf16 %v738_v14, %v732_v12 }
 0x124   :  { %205 = vbcast.lane.b32.xlu1 %v203_v27, 256  ;;  %226 = vbcast.lane.b32.xlu0 %v224_v28, 256  ;;  %v648_v27 = vld [vmem:[#allocation8 + $0x248] sm:$0xff]  ;;  %v654_v28 = vld [vmem:[#allocation8 + $0x278] sm:$0xff] }
 0x125   :  { %2330 = vmatprep.subr.bf16.mxu0 %v2329_v18  ;;  %v731_v18 = vld [vmem:[#allocation8 + $0x4e0] sm:$0xff] }
 0x128   :  { %212 = vbcast.lane.b32.xlu1 %v210_v29, 256  ;;  %233 = vbcast.lane.b32.xlu0 %v231_v30, 256  ;;  %v2335_v29 = vpack.c.bf16 %v641_v26, %v635_v25  ;;  %v2337_v30 = vpack.c.bf16 %v654_v28, %v648_v27  ;;  %v743_v25 = vld [vmem:[#allocation8 + $0x540] sm:$0xff]  ;;  %v749_v26 = vld [vmem:[#allocation8 + $0x570] sm:$0xff]  ;;  %v756_v27 = vld [vmem:[#allocation8 + $0x5a8] sm:$0xff] }
 0x129   :  { %v762_v28 = vld [vmem:[#allocation8 + $0x5d8] sm:$0xff] }
 0x12a   :  { %v2373_v31 = vpack.c.bf16 %v762_v28, %v756_v27 }
 0x12c   :  { %183 = vbcast.lane.b32.xlu1 %v181_v20, 256  ;;  %240 = vbcast.lane.b32.xlu0 %v238_v33, 256  ;;  %v629_v20 = vld [vmem:[#allocation8 + $0x1b0] sm:$0xff]  ;;  %v660_v33 = vld [vmem:[#allocation8 + $0x2a8] sm:$0xff] }
 0x12d   :  { %v2331_v23 = vpack.c.bf16 %v629_v20, %v623_v19  ;;  %v2341_v36 = vpack.c.bf16 %v666_v34, %v660_v33  ;;  %v737_v19 = vld [vmem:[#allocation8 + $0x510] sm:$0xff]  ;;  %v149_v20 = vpop.permute.xlu1 %148 }
 0x12e   :  { %v761_v33 = vld [vmem:[#allocation8 + $0x5d0] sm:$0xff] }
 0x12f   :  { %2332 = vmatpush1.bf16.msra.mxu0 %v2331_v23  ;;  %v2367_v23 = vpack.c.bf16 %v737_v19, %v731_v18  ;;  %v2375_v34 = vpack.c.bf16 %v761_v33, %v755_v32 }
 0x130   :  { %247 = vbcast.lane.b32.xlu1 %v245_v40, 256  ;;  %2334 = vmatprep.subr.bf16.mxu0 %v2333_v24  ;;  %v678_v40 = vld [vmem:[#allocation8 + $0x338] sm:$0xff]  ;;  %v2369_v24 = vpack.c.bf16 %v750_v22, %v744_v21 }
 0x131   :  { %v2345_v42 = vpack.c.bf16 %v678_v40, %v672_v39  ;;  %v128_v39 = vand.u32 127, %v127_v0 }
 0x133   :  { %2336 = vmatpush1.bf16.msra.mxu0 %v2335_v29  ;;  %v156_v29 = vpop.permute.xlu1 %155  ;;  %vm185_vm1 = vcmp.eq.s32.totalorder %v135_v38, %v128_v39  ;;  %vm186_vm4 = vcmp.eq.s32.totalorder %v142_v5, %v128_v39  ;;  %vm187_vm6 = vcmp.eq.s32.totalorder %v149_v20, %v128_v39 }
 0x134   :  { %2338 = vmatprep.subr.bf16.mxu0 %v2337_v30  ;;  %v2371_v30 = vpack.c.bf16 %v749_v26, %v743_v25  ;;  %vm188_vm3 = vcmp.eq.s32.totalorder %v156_v29, %v128_v39 }
 0x137   :  { %2340 = vmatpush1.bf16.msra.mxu0 %v2339_v35  ;;  %v163_v35 = vpop.permute.xlu1 %162 }
 0x138   :  { %2342 = vmatprep.subr.bf16.mxu0 %v2341_v36  ;;  %vm189_vm5 = vcmp.eq.s32.totalorder %v163_v35, %v128_v39 }
 0x13b   :  { %2344 = vmatpush1.bf16.msra.mxu0 %v2343_v41  ;;  %v170_v36 = vpop.permute.xlu1 %169 }
 0x13c   :  { %2346 = vmatprep.subr.bf16.mxu0 %v2345_v42  ;;  %vm190_vm7 = vcmp.eq.s32.totalorder %v170_v36, %v128_v39 }
 0x13f   :  { %2348 = vmatpush1.bf16.msra.mxu0 %v2347_v47  ;;  %v177_v37 = vpop.permute.xlu1 %176 }
 0x140   :  { %2350 = vmatprep.subr.bf16.mxu0 %v2349_v49  ;;  %vm191_vm8 = vcmp.eq.s32.totalorder %v177_v37, %v128_v39 }
 0x143   :  { %2352 = vmatpush1.bf16.msra.mxu0 %v2351_v54 }
 0x144   :  { %2354 = vmatprep.subr.bf16.mxu0 %v2353_v55 }
 0x147   :  { %2356 = vmatpush1.bf16.msra.mxu0 %v2355_v60 }
 0x148   :  { %2358 = vmatprep.subr.bf16.mxu0 %v2357_v61 }
 0x14b   :  { %2360 = vmatpush1.bf16.msra.mxu0 %v2359_v6 }
 0x14c   :  { %2362 = vmatprep.subr.bf16.mxu0 %v2361_v7 }
 0x14f   :  { %2364 = vmatpush1.bf16.msra.mxu0 %v2363_v15 }
 0x150   :  { %2366 = vmatprep.subr.bf16.mxu0 %v2365_v17 }
 0x153   :  { %2368 = vmatpush1.bf16.msra.mxu0 %v2367_v23 }
 0x154   :  { %2370 = vmatprep.subr.bf16.mxu0 %v2369_v24 }
 0x157   :  { %2372 = vmatpush1.bf16.msra.mxu0 %v2371_v30 }
 0x158   :  { %2374 = vmatprep.subr.bf16.mxu0 %v2373_v31 }
 0x15b   :  { %2376 = vmatpush1.bf16.msra.mxu0 %v2375_v34 }
 0x192   :  { %v199_v40 = vpop.permute.xlu1 %198  ;;  %v220_v41 = vpop.permute.xlu0 %219 }
 0x193   :  { %v249_v42 = vsel %vm185_vm1, %v199_v40, 0.0  ;;  %v252_v43 = vsel %vm188_vm3, %v220_v41, 0.0 }
 0x194   :  { %v258_v44 = vsel %vm257_vm2, %v249_v42, 0.0  ;;  %v279_v45 = vsel %vm257_vm2, %v252_v43, 0.0 }
 0x195   :  { %v259_v46 = vrot.slane %v258_v44, 4  ;;  %v280_v50 = vrot.slane %v279_v45, 4 }
 0x196   :  { %v206_v47 = vpop.permute.xlu1 %205  ;;  %v227_v49 = vpop.permute.xlu0 %226 }
 0x197   :  { %v250_v51 = vsel %vm186_vm4, %v206_v47, 0.0  ;;  %v253_v52 = vsel %vm189_vm5, %v227_v49, 0.0  ;;  %v260_v54 = vadd.f32 %v259_v46, %v258_v44  ;;  %v281_v59 = vadd.f32 %v280_v50, %v279_v45 }
 0x198   :  { %v265_v0 = vsel %vm257_vm2, %v250_v51, 0.0  ;;  %v286_v53 = vsel %vm257_vm2, %v253_v52, 0.0 }
 0x199   :  { %v266_v55 = vrot.slane %v265_v0, 4  ;;  %v287_v56 = vrot.slane %v286_v53, 4  ;;  %v261_v1 = vrot.slane %v260_v54, 2  ;;  %v282_v10 = vrot.slane %v281_v59, 2 }
 0x19a   :  { %v213_v57 = vpop.permute.xlu1 %212  ;;  %v234_v58 = vpop.permute.xlu0 %233 }
 0x19b   :  { %v267_v60 = vadd.f32 %v266_v55, %v265_v0  ;;  %v288_v61 = vadd.f32 %v287_v56, %v286_v53  ;;  %v251_v62 = vsel %vm187_vm6, %v213_v57, 0.0  ;;  %v254_v63 = vsel %vm190_vm7, %v234_v58, 0.0  ;;  %v316_v55 = vld [vmem:[#allocation7 + $0x10] sm:$0xff]  ;;  %v322_v56 = vld [vmem:[#allocation7 + $0x40] sm:$0xff] }
 0x19c   :  { %v272_v5 = vsel %vm257_vm2, %v251_v62, 0.0  ;;  %v293_v6 = vsel %vm257_vm2, %v254_v63, 0.0  ;;  %v262_v19 = vadd.f32 %v261_v1, %v260_v54  ;;  %v283_v25 = vadd.f32 %v282_v10, %v281_v59 }
 0x19d   :  { %v268_v4 = vrot.slane %v267_v60, 2  ;;  %v289_v14 = vrot.slane %v288_v61, 2  ;;  %v273_v15 = vrot.slane %v272_v5, 4  ;;  %v294_v17 = vrot.slane %v293_v6, 4 }
 0x19e   :  { %v184_v7 = vpop.permute.xlu1 %183  ;;  %v241_v8 = vpop.permute.xlu0 %240  ;;  %v263_v33 = vrot.slane %v262_v19, 1  ;;  %v284_v38 = vrot.slane %v283_v25, 1 }
 0x19f   :  { %v269_v12 = vadd.f32 %v268_v4, %v267_v60  ;;  %v255_v18 = vsel %vm191_vm8, %v241_v8, 0.0  ;;  %v274_v21 = vadd.f32 %v273_v15, %v272_v5  ;;  %v295_v22 = vadd.f32 %v294_v17, %v293_v6  ;;  %v329_v60 = vld [vmem:[#allocation7 + $0x78] sm:$0xff]  ;;  %v334_v8 = vld [vmem:[#allocation7 + $0xa0] sm:$0xff] }
 0x1a0   :  { %v300_v20 = vsel %vm257_vm2, %v255_v18, 0.0  ;;  %vm192_vm9 = vcmp.eq.s32.totalorder %v184_v7, %v128_v39  ;;  %v290_v27 = vadd.f32 %v289_v14, %v288_v61  ;;  %v264_v44 = vadd.f32 %v263_v33, %v262_v19  ;;  %v335_v61 = vld [vmem:[#allocation7 + $0xa8] sm:$0xff]  ;;  %v328_v7 = vld [vmem:[#allocation7 + $0x70] sm:$0xff]  ;;  %v325_v14 = vld [vmem:[#allocation7 + $0x58] sm:$0xff] }
 0x1a1   :  { %v301_v23 = vrot.slane %v300_v20, 4  ;;  %v270_v26 = vrot.slane %v269_v12, 1  ;;  %v275_v29 = vrot.slane %v274_v21, 2  ;;  %v296_v30 = vrot.slane %v295_v22, 2  ;;  %v318_v18 = vld [vmem:[#allocation7 + $0x20] sm:$0xff]  ;;  %v324_v19 = vld [vmem:[#allocation7 + $0x50] sm:$0xff] }
 0x1a2   :  { %v248_v24 = vpop.permute.xlu1 %247  ;;  %v291_v39 = vrot.slane %v290_v27, 1  ;;  %v285_v50 = vadd.f32 %v284_v38, %v283_v25  ;;  %v2299_v4 = vpack.c.bf16 %v322_v56, %v316_v55  ;;  %v2301_v6 = vpack.c.bf16 %v335_v61, %v329_v60  ;;  %v336_v25 = vld [vmem:[#allocation7 + $0xb0] sm:$0xff]  ;;  %v786_v33 = vld [vmem:[#allocation8 + $0x698] sm:$0xff]  ;;  %v792_v38 = vld [vmem:[#allocation8 + $0x6c8] sm:$0xff] }
 0x1a3   :  { %v256_v28 = vsel %vm192_vm9, %v248_v24, 0.0  ;;  %v302_v31 = vadd.f32 %v301_v23, %v300_v20  ;;  %v276_v35 = vadd.f32 %v275_v29, %v274_v21  ;;  %v297_v36 = vadd.f32 %v296_v30, %v295_v22  ;;  %v331_v20 = vld [vmem:[#allocation7 + $0x88] sm:$0xff]  ;;  %v337_v21 = vld [vmem:[#allocation7 + $0xb8] sm:$0xff]  ;;  %v330_v24 = vld [vmem:[#allocation7 + $0x80] sm:$0xff] }
 0x1a4   :  { %v307_v32 = vsel %vm257_vm2, %v256_v28, 0.0  ;;  %v271_v40 = vadd.f32 %v270_v26, %v269_v12  ;;  %v292_v0 = vadd.f32 %v291_v39, %v290_v27  ;;  %v319_v12 = vld [vmem:[#allocation7 + $0x28] sm:$0xff]  ;;  %v2303_v15 = vpack.c.bf16 %v334_v8, %v328_v7  ;;  %v774_v27 = vld [vmem:[#allocation8 + $0x638] sm:$0xff]  ;;  %v767_v30 = vld [vmem:[#allocation8 + $0x600] sm:$0xff] }
 0x1a5   :  { %v308_v34 = vrot.slane %v307_v32, 4  ;;  %v303_v37 = vrot.slane %v302_v31, 2  ;;  %v277_v42 = vrot.slane %v276_v35, 1  ;;  %v298_v45 = vrot.slane %v297_v36, 1  ;;  %v768_v26 = vld [vmem:[#allocation8 + $0x608] sm:$0xff]  ;;  %v791_v39 = vld [vmem:[#allocation8 + $0x6c0] sm:$0xff] }
 0x1a6   :  { %v347_v51 = vsel %vm346_vm10, %v271_v40, %v264_v44  ;;  %v2305_v17 = vpack.c.bf16 %v325_v14, %v319_v12  ;;  %v2307_v22 = vpack.c.bf16 %v324_v19, %v318_v18  ;;  %v2309_v23 = vpack.c.bf16 %v337_v21, %v331_v20  ;;  %v798_v40 = vld [vmem:[#allocation8 + $0x6f8] sm:$0xff]  ;;  %v828_v55 = vld [vmem:[#allocation8 + $0x7e8] sm:$0xff]  ;;  %v833_v60 = vld [vmem:[#allocation8 + $0x810] sm:$0xff] }
 0x1a7   :  { %v309_v41 = vadd.f32 %v308_v34, %v307_v32  ;;  %v304_v43 = vadd.f32 %v303_v37, %v302_v31  ;;  %v278_v47 = vadd.f32 %v277_v42, %v276_v35  ;;  %v299_v57 = vadd.f32 %v298_v45, %v297_v36  ;;  %v773_v31 = vld [vmem:[#allocation8 + $0x630] sm:$0xff]  ;;  %v780_v32 = vld [vmem:[#allocation8 + $0x668] sm:$0xff]  ;;  %v779_v36 = vld [vmem:[#allocation8 + $0x660] sm:$0xff] }
 0x1a8   :  { %v2311_v28 = vpack.c.bf16 %v336_v25, %v330_v24  ;;  %v2377_v29 = vpack.c.bf16 %v774_v27, %v768_v26  ;;  %v2379_v34 = vpack.c.bf16 %v773_v31, %v767_v30  ;;  %v2381_v35 = vpack.c.bf16 %v786_v33, %v780_v32  ;;  %v785_v37 = vld [vmem:[#allocation8 + $0x690] sm:$0xff]  ;;  %v810_v44 = vld [vmem:[#allocation8 + $0x758] sm:$0xff]  ;;  %v840_v61 = vld [vmem:[#allocation8 + $0x848] sm:$0xff] }
 0x1a9   :  { %v310_v46 = vrot.slane %v309_v41, 2  ;;  %v305_v49 = vrot.slane %v304_v43, 1  ;;  %v349_v53 = vsel %vm348_vm11, %v278_v47, %v347_v51  ;;  %v797_v42 = vld [vmem:[#allocation8 + $0x6f0] sm:$0xff]  ;;  %v803_v47 = vld [vmem:[#allocation8 + $0x720] sm:$0xff]  ;;  %v822_v51 = vld [vmem:[#allocation8 + $0x7b8] sm:$0xff] }
 0x1aa   :  { %v351_v59 = vsel %vm350_vm12, %v285_v50, %v349_v53  ;;  %v2387_v45 = vpack.c.bf16 %v797_v42, %v791_v39  ;;  %v816_v50 = vld [vmem:[#allocation8 + $0x788] sm:$0xff]  ;;  %v815_v53 = vld [vmem:[#allocation8 + $0x780] sm:$0xff]  ;;  %v834_v56 = vld [vmem:[#allocation8 + $0x818] sm:$0xff] }
 0x1ab   :  { %v311_v52 = vadd.f32 %v310_v46, %v309_v41  ;;  %v306_v54 = vadd.f32 %v305_v49, %v304_v43  ;;  %v353_v62 = vsel %vm352_vm13, %v292_v0, %v351_v59  ;;  %v2383_v41 = vpack.c.bf16 %v785_v37, %v779_v36  ;;  %v804_v43 = vld [vmem:[#allocation8 + $0x728] sm:$0xff]  ;;  %v809_v49 = vld [vmem:[#allocation8 + $0x750] sm:$0xff]  ;;  %v827_v59 = vld [vmem:[#allocation8 + $0x7e0] sm:$0xff] }
 0x1ac   :  { %v355_v1 = vsel %vm354_vm14, %v299_v57, %v353_v62  ;;  %v2389_v46 = vpack.c.bf16 %v810_v44, %v804_v43  ;;  %v2393_v0 = vpack.c.bf16 %v822_v51, %v816_v50  ;;  %v846_v62 = vld [vmem:[#allocation8 + $0x878] sm:$0xff]  ;;  %v851_v12 = vld [vmem:[#allocation8 + $0x8a0] sm:$0xff]  ;;  %v857_v14 = vld [vmem:[#allocation8 + $0x8d0] sm:$0xff] }
 0x1ad   :  { %v312_v58 = vrot.slane %v311_v52, 1  ;;  %v357_v5 = vsel %vm356_vm15, %v306_v54, %v355_v1  ;;  %v821_v54 = vld [vmem:[#allocation8 + $0x7b0] sm:$0xff]  ;;  %v2401_v1 = vpack.c.bf16 %v846_v62, %v840_v61  ;;  %v858_v7 = vld [vmem:[#allocation8 + $0x8d8] sm:$0xff]  ;;  %v2407_v18 = vpack.c.bf16 %v857_v14, %v851_v12  ;;  %v863_v20 = vld [vmem:[#allocation8 + $0x900] sm:$0xff] }
 0x1ae   :  { %v2395_v57 = vpack.c.bf16 %v821_v54, %v815_v53  ;;  %v869_v21 = vld [vmem:[#allocation8 + $0x930] sm:$0xff]  ;;  %v875_v26 = vld [vmem:[#allocation8 + $0x960] sm:$0xff]  ;;  %v942_v53 = vld [vmem:[#allocation8 + $0xb78] sm:$0xff] }
 0x1af   :  { %v313_v63 = vadd.f32 %v312_v58, %v311_v52  ;;  %v2391_v52 = vpack.c.bf16 %v809_v49, %v803_v47  ;;  %v2397_v58 = vpack.c.bf16 %v834_v56, %v828_v55  ;;  %v2411_v24 = vpack.c.bf16 %v869_v21, %v863_v20  ;;  %v881_v27 = vld [vmem:[#allocation8 + $0x990] sm:$0xff]  ;;  %v887_v32 = vld [vmem:[#allocation8 + $0x9c0] sm:$0xff]  ;;  %v948_v61 = vld [vmem:[#allocation8 + $0xba8] sm:$0xff] }
 0x1b0   :  { %v2415_v30 = vpack.c.bf16 %v881_v27, %v875_v26  ;;  %v893_v33 = vld [vmem:[#allocation8 + $0x9f0] sm:$0xff]  ;;  %v911_v43 = vld [vmem:[#allocation8 + $0xa80] sm:$0xff]  ;;  %v954_v62 = vld [vmem:[#allocation8 + $0xbd8] sm:$0xff] }
 0x1b1   :  { %v359_v10 = vsel %vm358_vm0, %v313_v63, %v357_v5  ;;  %v2399_v63 = vpack.c.bf16 %v833_v60, %v827_v59  ;;  %v845_v5 = vld [vmem:[#allocation8 + $0x870] sm:$0xff]  ;;  %v2419_v36 = vpack.c.bf16 %v893_v33, %v887_v32  ;;  %v923_v50 = vld [vmem:[#allocation8 + $0xae0] sm:$0xff]  ;;  %v584_v59 = vld [vmem:[#allocation8 + $0x48] sm:$0xff] }
 0x1b2   :  { %2180 = vmatmul.mubr.msk.f32.vlgmr.msra.gmra.mrb[0].mxu1 %vm257_vm2, %v359_v10  ;;  %v917_v44 = vld [vmem:[#allocation8 + $0xab0] sm:$0xff]  ;;  %v935_v55 = vld [vmem:[#allocation8 + $0xb40] sm:$0xff]  ;;  %v590_v14 = vld [vmem:[#allocation8 + $0x78] sm:$0xff] }
 0x1b3   :  { %2300 = vmatpush1.bf16.msra.mxu1 %v2299_v4  ;;  %497 = vmatprep.mubr.f32.mxu1 %v3252_v48  ;;  %v839_v4 = vld [vmem:[#allocation8 + $0x840] sm:$0xff]  ;;  %v2427_v47 = vpack.c.bf16 %v917_v44, %v911_v43  ;;  %v929_v51 = vld [vmem:[#allocation8 + $0xb10] sm:$0xff]  ;;  %v978_v32 = vld [vmem:[#allocation8 + $0xc98] sm:$0xff] }
 0x1b4   :  { %2302 = vmatprep.subr.bf16.mxu1 %v2301_v6  ;;  %v852_v6 = vld [vmem:[#allocation8 + $0x8a8] sm:$0xff]  ;;  %v2403_v8 = vpack.c.bf16 %v845_v5, %v839_v4  ;;  %v941_v56 = vld [vmem:[#allocation8 + $0xb70] sm:$0xff]  ;;  %v583_v12 = vld [vmem:[#allocation8 + $0x40] sm:$0xff] }
 0x1b5   :  { %v953_v4 = vld [vmem:[#allocation8 + $0xbd0] sm:$0xff]  ;;  %v959_v26 = vld [vmem:[#allocation8 + $0xc00] sm:$0xff]  ;;  %v614_v33 = vld [vmem:[#allocation8 + $0x138] sm:$0xff] }
 0x1b6   :  { %v589_v21 = vld [vmem:[#allocation8 + $0x70] sm:$0xff]  ;;  %v619_v43 = vld [vmem:[#allocation8 + $0x160] sm:$0xff]  ;;  %v984_v44 = vld [vmem:[#allocation8 + $0xcc8] sm:$0xff] }
 0x1b7   :  { %2304 = vmatpush1.bf16.msra.mxu1 %v2303_v15  ;;  %v864_v15 = vld [vmem:[#allocation8 + $0x908] sm:$0xff]  ;;  %v965_v27 = vld [vmem:[#allocation8 + $0xc30] sm:$0xff] }
 0x1b8   :  { %2306 = vmatprep.subr.bf16.mxu1 %v2305_v17  ;;  %v870_v17 = vld [vmem:[#allocation8 + $0x938] sm:$0xff] }
 0x1b9   :  { %v2409_v19 = vpack.c.bf16 %v870_v17, %v864_v15  ;;  %v596_v15 = vld [vmem:[#allocation8 + $0xa8] sm:$0xff] }
 0x1ba   :  { %2181 = vmatmul.mubr.msk.f32.vlgmr.msra.gmra.mrb[2].mxu1 %vm257_vm2, %v359_v10  ;;  %v2509_v20 = vpack.c.bf16 %v596_v15, %v590_v14  ;;  %v650_v14 = vld [vmem:[#allocation8 + $0x258] sm:$0xff]  ;;  %v656_v15 = vld [vmem:[#allocation8 + $0x288] sm:$0xff] }
 0x1bb   :  { %2308 = vmatpush1.bf16.msra.mxu1 %v2307_v22  ;;  %568 = vmatprep.mubr.f32.mxu1 %v3252_v48  ;;  %v2385_v48 = vpack.c.bf16 %v798_v40, %v792_v38  ;;  %v876_v22 = vld [vmem:[#allocation8 + $0x968] sm:$0xff]  ;;  %v899_v38 = vld [vmem:[#allocation8 + $0xa20] sm:$0xff]  ;;  %v905_v40 = vld [vmem:[#allocation8 + $0xa50] sm:$0xff] }
 0x1bc   :  { %2310 = vmatprep.subr.bf16.mxu1 %v2309_v23  ;;  %v882_v23 = vld [vmem:[#allocation8 + $0x998] sm:$0xff]  ;;  %v2423_v39 = vpack.c.bf16 %v905_v40, %v899_v38  ;;  %v971_v38 = vld [vmem:[#allocation8 + $0xc60] sm:$0xff]  ;;  %v977_v40 = vld [vmem:[#allocation8 + $0xc90] sm:$0xff] }
 0x1bd   :  { %v2413_v25 = vpack.c.bf16 %v882_v23, %v876_v22  ;;  %v595_v22 = vld [vmem:[#allocation8 + $0xa0] sm:$0xff]  ;;  %v602_v23 = vld [vmem:[#allocation8 + $0xd8] sm:$0xff] }
 0x1bf   :  { %2312 = vmatpush1.bf16.msra.mxu1 %v2311_v28  ;;  %v888_v28 = vld [vmem:[#allocation8 + $0x9c8] sm:$0xff] }
 0x1c0   :  { %2378 = vmatprep.subr.bf16.mxu1 %v2377_v29  ;;  %v894_v29 = vld [vmem:[#allocation8 + $0x9f8] sm:$0xff] }
 0x1c1   :  { %v2417_v31 = vpack.c.bf16 %v894_v29, %v888_v28  ;;  %v601_v29 = vld [vmem:[#allocation8 + $0xd0] sm:$0xff] }
 0x1c2   :  { %2182 = vmatmul.mubr.msk.f32.vlgmr.msra.gmra.mrb[4].mxu1 %vm257_vm2, %v359_v10  ;;  %v2405_v10 = vpack.c.bf16 %v858_v7, %v852_v6  ;;  %v960_v6 = vld [vmem:[#allocation8 + $0xc08] sm:$0xff]  ;;  %v966_v7 = vld [vmem:[#allocation8 + $0xc38] sm:$0xff] }
 0x1c3   :  { %2380 = vmatpush1.bf16.msra.mxu1 %v2379_v34  ;;  %v900_v34 = vld [vmem:[#allocation8 + $0xa28] sm:$0xff] }
 0x1c4   :  { %2382 = vmatprep.subr.bf16.mxu1 %v2381_v35  ;;  %v906_v35 = vld [vmem:[#allocation8 + $0xa58] sm:$0xff] }
 0x1c5   :  { %v2421_v37 = vpack.c.bf16 %v906_v35, %v900_v34  ;;  %v620_v34 = vld [vmem:[#allocation8 + $0x168] sm:$0xff] }
 0x1c7   :  { %2384 = vmatpush1.bf16.msra.mxu1 %v2383_v41  ;;  %v912_v41 = vld [vmem:[#allocation8 + $0xa88] sm:$0xff] }
 0x1c8   :  { %2386 = vmatprep.subr.bf16.mxu1 %v2385_v48  ;;  %v918_v48 = vld [vmem:[#allocation8 + $0xab8] sm:$0xff] }
 0x1c9   :  { %v2425_v42 = vpack.c.bf16 %v918_v48, %v912_v41 }
 0x1cb   :  { %2388 = vmatpush1.bf16.msra.mxu1 %v2387_v45  ;;  %v924_v45 = vld [vmem:[#allocation8 + $0xae8] sm:$0xff] }
 0x1cc   :  { %2390 = vmatprep.subr.bf16.mxu1 %v2389_v46  ;;  %v930_v46 = vld [vmem:[#allocation8 + $0xb18] sm:$0xff] }
 0x1cd   :  { %v2429_v49 = vpack.c.bf16 %v930_v46, %v924_v45  ;;  %v990_v45 = vld [vmem:[#allocation8 + $0xcf8] sm:$0xff] }
 0x1ce   :  { %v626_v46 = vld [vmem:[#allocation8 + $0x198] sm:$0xff] }
 0x1cf   :  { %2392 = vmatpush1.bf16.msra.mxu1 %v2391_v52  ;;  %v2431_v52 = vpack.c.bf16 %v929_v51, %v923_v50  ;;  %v983_v51 = vld [vmem:[#allocation8 + $0xcc0] sm:$0xff] }
 0x1d0   :  { %2394 = vmatprep.subr.bf16.mxu1 %v2393_v0  ;;  %v936_v0 = vld [vmem:[#allocation8 + $0xb48] sm:$0xff] }
 0x1d1   :  { %v2433_v54 = vpack.c.bf16 %v942_v53, %v936_v0  ;;  %v2449_v0 = vpack.c.bf16 %v990_v45, %v984_v44 }
 0x1d3   :  { %2396 = vmatpush1.bf16.msra.mxu1 %v2395_v57  ;;  %v578_v57 = vld [vmem:[#allocation8 + $0x18] sm:$0xff] }
 0x1d4   :  { %2398 = vmatprep.subr.bf16.mxu1 %v2397_v58  ;;  %v2435_v58 = vpack.c.bf16 %v941_v56, %v935_v55  ;;  %v2505_v60 = vpack.c.bf16 %v584_v59, %v578_v57  ;;  %v631_v55 = vld [vmem:[#allocation8 + $0x1c0] sm:$0xff]  ;;  %v996_v56 = vld [vmem:[#allocation8 + $0xd28] sm:$0xff]  ;;  %v1002_v57 = vld [vmem:[#allocation8 + $0xd58] sm:$0xff] }
 0x1d5   :  { %v644_v59 = vld [vmem:[#allocation8 + $0x228] sm:$0xff] }
 0x1d6   :  { %2506 = vmatprep.subr.bf16.mxu0 %v2505_v60 }
 0x1d7   :  { %2400 = vmatpush1.bf16.msra.mxu1 %v2399_v63  ;;  %v947_v63 = vld [vmem:[#allocation8 + $0xba0] sm:$0xff] }
 0x1d8   :  { %2402 = vmatprep.subr.bf16.mxu1 %v2401_v1  ;;  %v2437_v1 = vpack.c.bf16 %v954_v62, %v948_v61  ;;  %v2439_v5 = vpack.c.bf16 %v953_v4, %v947_v63  ;;  %v995_v63 = vld [vmem:[#allocation8 + $0xd20] sm:$0xff] }
 0x1db   :  { %2404 = vmatpush1.bf16.msra.mxu1 %v2403_v8  ;;  %v2441_v8 = vpack.c.bf16 %v966_v7, %v960_v6  ;;  %v637_v7 = vld [vmem:[#allocation8 + $0x1f0] sm:$0xff] }
 0x1dc   :  { %2406 = vmatprep.subr.bf16.mxu1 %v2405_v10  ;;  %v577_v10 = vld [vmem:[#allocation8 + $0x10] sm:$0xff] }
 0x1df   :  { %2408 = vmatpush1.bf16.msra.mxu1 %v2407_v18  ;;  %v2507_v18 = vpack.c.bf16 %v583_v12, %v577_v10  ;;  %v1008_v10 = vld [vmem:[#allocation8 + $0xd88] sm:$0xff]  ;;  %v1014_v12 = vld [vmem:[#allocation8 + $0xdb8] sm:$0xff] }
 0x1e0   :  { %2410 = vmatprep.subr.bf16.mxu1 %v2409_v19 }
 0x1e3   :  { %2412 = vmatpush1.bf16.msra.mxu1 %v2411_v24  ;;  %v608_v24 = vld [vmem:[#allocation8 + $0x108] sm:$0xff] }
 0x1e4   :  { %2414 = vmatprep.subr.bf16.mxu1 %v2413_v25  ;;  %v2511_v25 = vpack.c.bf16 %v595_v22, %v589_v21  ;;  %v2513_v28 = vpack.c.bf16 %v608_v24, %v602_v23  ;;  %v1007_v21 = vld [vmem:[#allocation8 + $0xd80] sm:$0xff]  ;;  %v1013_v22 = vld [vmem:[#allocation8 + $0xdb0] sm:$0xff]  ;;  %v2457_v23 = vpack.c.bf16 %v1014_v12, %v1008_v10  ;;  %v2529_v24 = vpack.c.bf16 %v656_v15, %v650_v14 }
 0x1e5   :  { %v1055_v14 = vld [vmem:[#allocation8 + $0xf00] sm:$0xff]  ;;  %v1061_v15 = vld [vmem:[#allocation8 + $0xf30] sm:$0xff] }
 0x1e7   :  { %2416 = vmatpush1.bf16.msra.mxu1 %v2415_v30  ;;  %v607_v30 = vld [vmem:[#allocation8 + $0x100] sm:$0xff] }
 0x1e8   :  { %2418 = vmatprep.subr.bf16.mxu1 %v2417_v31  ;;  %v972_v31 = vld [vmem:[#allocation8 + $0xc68] sm:$0xff] }
 0x1e9   :  { %v2445_v48 = vpack.c.bf16 %v978_v32, %v972_v31  ;;  %v2459_v31 = vpack.c.bf16 %v1013_v22, %v1007_v21  ;;  %v697_v21 = vld [vmem:[#allocation8 + $0x3d0] sm:$0xff]  ;;  %v703_v22 = vld [vmem:[#allocation8 + $0x400] sm:$0xff] }
 0x1eb   :  { %2420 = vmatpush1.bf16.msra.mxu1 %v2419_v36  ;;  %v2443_v36 = vpack.c.bf16 %v965_v27, %v959_v26  ;;  %v655_v26 = vld [vmem:[#allocation8 + $0x280] sm:$0xff]  ;;  %v1020_v27 = vld [vmem:[#allocation8 + $0xde8] sm:$0xff] }
 0x1ec   :  { %2422 = vmatprep.subr.bf16.mxu1 %v2421_v37  ;;  %v2515_v37 = vpack.c.bf16 %v607_v30, %v601_v29  ;;  %v662_v29 = vld [vmem:[#allocation8 + $0x2b8] sm:$0xff]  ;;  %v668_v30 = vld [vmem:[#allocation8 + $0x2e8] sm:$0xff] }
 0x1ef   :  { %2424 = vmatpush1.bf16.msra.mxu1 %v2423_v39  ;;  %v2517_v39 = vpack.c.bf16 %v620_v34, %v614_v33  ;;  %v1019_v33 = vld [vmem:[#allocation8 + $0xde0] sm:$0xff]  ;;  %v1025_v34 = vld [vmem:[#allocation8 + $0xe10] sm:$0xff] }
 0x1f0   :  { %2426 = vmatprep.subr.bf16.mxu1 %v2425_v42  ;;  %v613_v42 = vld [vmem:[#allocation8 + $0x130] sm:$0xff]  ;;  %v2463_v44 = vpack.c.bf16 %v1025_v34, %v1019_v33  ;;  %v715_v34 = vld [vmem:[#allocation8 + $0x460] sm:$0xff] }
 0x1f1   :  { %v2519_v50 = vpack.c.bf16 %v619_v43, %v613_v42  ;;  %v674_v42 = vld [vmem:[#allocation8 + $0x318] sm:$0xff]  ;;  %v680_v43 = vld [vmem:[#allocation8 + $0x348] sm:$0xff]  ;;  %v709_v33 = vld [vmem:[#allocation8 + $0x430] sm:$0xff] }
 0x1f3   :  { %2428 = vmatpush1.bf16.msra.mxu1 %v2427_v47  ;;  %v632_v47 = vld [vmem:[#allocation8 + $0x1c8] sm:$0xff] }
 0x1f4   :  { %2430 = vmatprep.subr.bf16.mxu1 %v2429_v49  ;;  %v2447_v49 = vpack.c.bf16 %v977_v40, %v971_v38  ;;  %v2521_v53 = vpack.c.bf16 %v632_v47, %v626_v46  ;;  %v661_v38 = vld [vmem:[#allocation8 + $0x2b0] sm:$0xff]  ;;  %v667_v40 = vld [vmem:[#allocation8 + $0x2e0] sm:$0xff] }
 0x1f5   :  { %v2535_v45 = vpack.c.bf16 %v667_v40, %v661_v38  ;;  %v1031_v46 = vld [vmem:[#allocation8 + $0xe40] sm:$0xff]  ;;  %v1037_v47 = vld [vmem:[#allocation8 + $0xe70] sm:$0xff]  ;;  %v722_v38 = vld [vmem:[#allocation8 + $0x498] sm:$0xff] }
 0x1f6   :  { %v728_v40 = vld [vmem:[#allocation8 + $0x4c8] sm:$0xff] }
 0x1f7   :  { %2432 = vmatpush1.bf16.msra.mxu1 %v2431_v52  ;;  %v989_v52 = vld [vmem:[#allocation8 + $0xcf0] sm:$0xff] }
 0x1f8   :  { %2434 = vmatprep.subr.bf16.mxu1 %v2433_v54  ;;  %v625_v54 = vld [vmem:[#allocation8 + $0x190] sm:$0xff]  ;;  %v2451_v61 = vpack.c.bf16 %v989_v52, %v983_v51  ;;  %v679_v52 = vld [vmem:[#allocation8 + $0x340] sm:$0xff] }
 0x1f9   :  { %v2523_v62 = vpack.c.bf16 %v631_v55, %v625_v54  ;;  %v673_v51 = vld [vmem:[#allocation8 + $0x310] sm:$0xff]  ;;  %v686_v54 = vld [vmem:[#allocation8 + $0x378] sm:$0xff]  ;;  %v692_v55 = vld [vmem:[#allocation8 + $0x3a8] sm:$0xff] }
 0x1fb   :  { %2436 = vmatpush1.bf16.msra.mxu1 %v2435_v58  ;;  %v638_v58 = vld [vmem:[#allocation8 + $0x1f8] sm:$0xff] }
 0x1fc   :  { %2438 = vmatprep.subr.bf16.mxu1 %v2437_v1  ;;  %v1001_v1 = vld [vmem:[#allocation8 + $0xd50] sm:$0xff]  ;;  %v2525_v6 = vpack.c.bf16 %v644_v59, %v638_v58  ;;  %v1043_v58 = vld [vmem:[#allocation8 + $0xea0] sm:$0xff] }
 0x1fd   :  { %v1049_v59 = vld [vmem:[#allocation8 + $0xed0] sm:$0xff] }
 0x1fe   :  { %v2471_v10 = vpack.c.bf16 %v1049_v59, %v1043_v58  ;;  %v733_v58 = vld [vmem:[#allocation8 + $0x4f0] sm:$0xff]  ;;  %v739_v59 = vld [vmem:[#allocation8 + $0x520] sm:$0xff] }
 0x1ff   :  { %2440 = vmatpush1.bf16.msra.mxu1 %v2439_v5  ;;  %v2453_v5 = vpack.c.bf16 %v1002_v57, %v996_v56  ;;  %v2467_v56 = vpack.c.bf16 %v1037_v47, %v1031_v46  ;;  %v2539_v57 = vpack.c.bf16 %v679_v52, %v673_v51  ;;  %v721_v46 = vld [vmem:[#allocation8 + $0x490] sm:$0xff]  ;;  %v727_v47 = vld [vmem:[#allocation8 + $0x4c0] sm:$0xff]  ;;  %v734_v51 = vld [vmem:[#allocation8 + $0x4f8] sm:$0xff] }
 0x200   :  { %2442 = vmatprep.subr.bf16.mxu1 %v2441_v8  ;;  %v643_v8 = vld [vmem:[#allocation8 + $0x220] sm:$0xff]  ;;  %v740_v52 = vld [vmem:[#allocation8 + $0x528] sm:$0xff] }
 0x285   :  { %v3430_v17 = vpop.f32.mrb[0].mxu1 }
 0x286   :  { %v3432_v19 = vpop.f32.mrb[1].mxu1 }
 0x287   :  { %1247 = vmatprep.mubr.f32.mxu0 %v3432_v19 }
 0x288   :  { %1248 = vmatmul.mubr.f32.vlgmr.msra.gmra.mrb[0].mxu0 %v3430_v17 }
 0x289   :  { %2508 = vmatpush1.bf16.msra.mxu0 %v2507_v18  ;;  %1460 = vmatprep.mubr.f32.mxu0 %v3432_v19  ;;  %v2455_v18 = vpack.c.bf16 %v1001_v1, %v995_v63  ;;  %v685_v63 = vld [vmem:[#allocation8 + $0x370] sm:$0xff]  ;;  %v691_v1 = vld [vmem:[#allocation8 + $0x3a0] sm:$0xff] }
 0x28a   :  { %2510 = vmatprep.subr.bf16.mxu0 %v2509_v20  ;;  %v2527_v20 = vpack.c.bf16 %v643_v8, %v637_v7  ;;  %v698_v7 = vld [vmem:[#allocation8 + $0x3d8] sm:$0xff]  ;;  %v704_v8 = vld [vmem:[#allocation8 + $0x408] sm:$0xff]  ;;  %v2543_v12 = vpack.c.bf16 %v691_v1, %v685_v63 }
 0x28b   :  { %v746_v63 = vld [vmem:[#allocation8 + $0x558] sm:$0xff]  ;;  %v752_v1 = vld [vmem:[#allocation8 + $0x588] sm:$0xff] }
 0x28d   :  { %v3437_v35 = vpop.f32.mrb[2].mxu1  ;;  %2512 = vmatpush1.bf16.msra.mxu0 %v2511_v25  ;;  %v649_v25 = vld [vmem:[#allocation8 + $0x250] sm:$0xff] }
 0x28e   :  { %v3439_v41 = vpop.f32.mrb[3].mxu1  ;;  %2514 = vmatprep.subr.bf16.mxu0 %v2513_v28  ;;  %v1026_v28 = vld [vmem:[#allocation8 + $0xe18] sm:$0xff]  ;;  %v2531_v32 = vpack.c.bf16 %v655_v26, %v649_v25  ;;  %v716_v26 = vld [vmem:[#allocation8 + $0x468] sm:$0xff] }
 0x28f   :  { %1318 = vmatprep.mubr.f32.mxu1 %v3439_v41  ;;  %v710_v25 = vld [vmem:[#allocation8 + $0x438] sm:$0xff] }
 0x290   :  { %1319 = vmatmul.mubr.f32.vlgmr.msra.gmra.mrb[6].mxu1 %v3437_v35 }
 0x291   :  { %2444 = vmatpush1.bf16.msra.mxu1 %v2443_v36  ;;  %2516 = vmatpush1.bf16.msra.mxu0 %v2515_v37  ;;  %v2461_v36 = vpack.c.bf16 %v1026_v28, %v1020_v27  ;;  %v2533_v37 = vpack.c.bf16 %v668_v30, %v662_v29  ;;  %v2475_v27 = vpack.c.bf16 %v1061_v15, %v1055_v14  ;;  %v1067_v29 = vld [vmem:[#allocation8 + $0xf60] sm:$0xff]  ;;  %v1073_v30 = vld [vmem:[#allocation8 + $0xf90] sm:$0xff] }
 0x292   :  { %2446 = vmatprep.subr.bf16.mxu1 %v2445_v48  ;;  %2518 = vmatprep.subr.bf16.mxu0 %v2517_v39  ;;  %v1032_v48 = vld [vmem:[#allocation8 + $0xe48] sm:$0xff]  ;;  %v1038_v39 = vld [vmem:[#allocation8 + $0xe78] sm:$0xff]  ;;  %v2547_v28 = vpack.c.bf16 %v703_v22, %v697_v21  ;;  %v745_v14 = vld [vmem:[#allocation8 + $0x550] sm:$0xff] }
 0x293   :  { %v751_v15 = vld [vmem:[#allocation8 + $0x580] sm:$0xff]  ;;  %v758_v21 = vld [vmem:[#allocation8 + $0x5b8] sm:$0xff]  ;;  %v764_v22 = vld [vmem:[#allocation8 + $0x5e8] sm:$0xff] }
 0x295   :  { %2448 = vmatpush1.bf16.msra.mxu1 %v2447_v49  ;;  %v3443_v60 = vpop.f32.mrb[4].mxu1  ;;  %2520 = vmatpush1.bf16.msra.mxu0 %v2519_v50  ;;  %v2465_v49 = vpack.c.bf16 %v1038_v39, %v1032_v48  ;;  %v2537_v50 = vpack.c.bf16 %v680_v43, %v674_v42  ;;  %v2479_v48 = vpack.c.bf16 %v1073_v30, %v1067_v29  ;;  %v1079_v42 = vld [vmem:[#allocation8 + $0xfc0] sm:$0xff]  ;;  %v1085_v43 = vld [vmem:[#allocation8 + $0xff0] sm:$0xff] }
 0x296   :  { %v3445_v4 = vpop.f32.mrb[5].mxu1  ;;  %2450 = vmatprep.subr.bf16.mxu1 %v2449_v0  ;;  %2522 = vmatprep.subr.bf16.mxu0 %v2521_v53  ;;  %v1044_v0 = vld [vmem:[#allocation8 + $0xea8] sm:$0xff]  ;;  %v1050_v53 = vld [vmem:[#allocation8 + $0xed8] sm:$0xff]  ;;  %v2551_v39 = vpack.c.bf16 %v715_v34, %v709_v33  ;;  %v757_v29 = vld [vmem:[#allocation8 + $0x5b0] sm:$0xff] }
 0x297   :  { %1389 = vmatprep.mubr.f32.mxu1 %v3445_v4  ;;  %v763_v30 = vld [vmem:[#allocation8 + $0x5e0] sm:$0xff]  ;;  %v770_v33 = vld [vmem:[#allocation8 + $0x618] sm:$0xff]  ;;  %v776_v34 = vld [vmem:[#allocation8 + $0x648] sm:$0xff] }
 0x299   :  { %2452 = vmatpush1.bf16.msra.mxu1 %v2451_v61  ;;  %2524 = vmatpush1.bf16.msra.mxu0 %v2523_v62  ;;  %v2469_v61 = vpack.c.bf16 %v1050_v53, %v1044_v0  ;;  %v2541_v62 = vpack.c.bf16 %v692_v55, %v686_v54  ;;  %v2483_v0 = vpack.c.bf16 %v1085_v43, %v1079_v42  ;;  %v1091_v54 = vld [vmem:[#allocation8 + $0x1020] sm:$0xff]  ;;  %v1097_v55 = vld [vmem:[#allocation8 + $0x1050] sm:$0xff] }
 0x29a   :  { %2454 = vmatprep.subr.bf16.mxu1 %v2453_v5  ;;  %2526 = vmatprep.subr.bf16.mxu0 %v2525_v6  ;;  %v1056_v5 = vld [vmem:[#allocation8 + $0xf08] sm:$0xff]  ;;  %v1062_v6 = vld [vmem:[#allocation8 + $0xf38] sm:$0xff]  ;;  %v2555_v53 = vpack.c.bf16 %v727_v47, %v721_v46  ;;  %v769_v42 = vld [vmem:[#allocation8 + $0x610] sm:$0xff] }
 0x29b   :  { %v775_v43 = vld [vmem:[#allocation8 + $0x640] sm:$0xff]  ;;  %v782_v46 = vld [vmem:[#allocation8 + $0x678] sm:$0xff]  ;;  %v788_v47 = vld [vmem:[#allocation8 + $0x6a8] sm:$0xff] }
 0x29d   :  { %2456 = vmatpush1.bf16.msra.mxu1 %v2455_v18  ;;  %2528 = vmatpush1.bf16.msra.mxu0 %v2527_v20  ;;  %v2473_v18 = vpack.c.bf16 %v1062_v6, %v1056_v5  ;;  %v2545_v20 = vpack.c.bf16 %v704_v8, %v698_v7  ;;  %v2487_v5 = vpack.c.bf16 %v1097_v55, %v1091_v54  ;;  %v1103_v7 = vld [vmem:[#allocation8 + $0x1080] sm:$0xff]  ;;  %v1109_v8 = vld [vmem:[#allocation8 + $0x10b0] sm:$0xff]  ;;  %v580_v55 = vld [vmem:[#allocation8 + $0x28] sm:$0xff] }
 0x29e   :  { %2458 = vmatprep.subr.bf16.mxu1 %v2457_v23  ;;  %2530 = vmatprep.subr.bf16.mxu0 %v2529_v24  ;;  %v1068_v23 = vld [vmem:[#allocation8 + $0xf68] sm:$0xff]  ;;  %v1074_v24 = vld [vmem:[#allocation8 + $0xf98] sm:$0xff]  ;;  %v2559_v6 = vpack.c.bf16 %v739_v59, %v733_v58  ;;  %v787_v54 = vld [vmem:[#allocation8 + $0x6a0] sm:$0xff] }
 0x29f   :  { %v794_v58 = vld [vmem:[#allocation8 + $0x6d8] sm:$0xff]  ;;  %v800_v59 = vld [vmem:[#allocation8 + $0x708] sm:$0xff] }
 0x2a1   :  { %2460 = vmatpush1.bf16.msra.mxu1 %v2459_v31  ;;  %2532 = vmatpush1.bf16.msra.mxu0 %v2531_v32  ;;  %v2477_v31 = vpack.c.bf16 %v1074_v24, %v1068_v23  ;;  %v2549_v32 = vpack.c.bf16 %v716_v26, %v710_v25  ;;  %v2491_v23 = vpack.c.bf16 %v1109_v8, %v1103_v7  ;;  %v1115_v25 = vld [vmem:[#allocation8 + $0x10e0] sm:$0xff]  ;;  %v1121_v26 = vld [vmem:[#allocation8 + $0x1110] sm:$0xff] }
 0x2a2   :  { %2462 = vmatprep.subr.bf16.mxu1 %v2461_v36  ;;  %2534 = vmatprep.subr.bf16.mxu0 %v2533_v37  ;;  %v1080_v36 = vld [vmem:[#allocation8 + $0xfc8] sm:$0xff]  ;;  %v1086_v37 = vld [vmem:[#allocation8 + $0xff8] sm:$0xff]  ;;  %v2563_v24 = vpack.c.bf16 %v751_v15, %v745_v14  ;;  %v793_v7 = vld [vmem:[#allocation8 + $0x6d0] sm:$0xff] }
 0x2a3   :  { %v799_v8 = vld [vmem:[#allocation8 + $0x700] sm:$0xff]  ;;  %v806_v14 = vld [vmem:[#allocation8 + $0x738] sm:$0xff]  ;;  %v812_v15 = vld [vmem:[#allocation8 + $0x768] sm:$0xff] }
 0x2a5   :  { %2464 = vmatpush1.bf16.msra.mxu1 %v2463_v44  ;;  %2536 = vmatpush1.bf16.msra.mxu0 %v2535_v45  ;;  %v2481_v44 = vpack.c.bf16 %v1086_v37, %v1080_v36  ;;  %v2553_v45 = vpack.c.bf16 %v728_v40, %v722_v38  ;;  %v2495_v36 = vpack.c.bf16 %v1121_v26, %v1115_v25  ;;  %v1127_v38 = vld [vmem:[#allocation8 + $0x1140] sm:$0xff] }
 0x2a6   :  { %2466 = vmatprep.subr.bf16.mxu1 %v2465_v49  ;;  %2538 = vmatprep.subr.bf16.mxu0 %v2537_v50  ;;  %v1092_v49 = vld [vmem:[#allocation8 + $0x1028] sm:$0xff]  ;;  %v1098_v50 = vld [vmem:[#allocation8 + $0x1058] sm:$0xff]  ;;  %v2567_v37 = vpack.c.bf16 %v763_v30, %v757_v29  ;;  %v2581_v25 = vpack.c.bf16 %v812_v15, %v806_v14  ;;  %v811_v26 = vld [vmem:[#allocation8 + $0x760] sm:$0xff] }
 0x2a7   :  { %v818_v29 = vld [vmem:[#allocation8 + $0x798] sm:$0xff]  ;;  %v824_v30 = vld [vmem:[#allocation8 + $0x7c8] sm:$0xff]  ;;  %v639_v14 = vld [vmem:[#allocation8 + $0x200] sm:$0xff] }
 0x2a8   :  { %v645_v15 = vld [vmem:[#allocation8 + $0x230] sm:$0xff] }
 0x2a9   :  { %2468 = vmatpush1.bf16.msra.mxu1 %v2467_v56  ;;  %2540 = vmatpush1.bf16.msra.mxu0 %v2539_v57  ;;  %v2485_v56 = vpack.c.bf16 %v1098_v50, %v1092_v49  ;;  %v2557_v57 = vpack.c.bf16 %v740_v52, %v734_v51  ;;  %v2571_v50 = vpack.c.bf16 %v775_v43, %v769_v42  ;;  %v1139_v51 = vld [vmem:[#allocation8 + $0x11a0] sm:$0xff]  ;;  %v1145_v52 = vld [vmem:[#allocation8 + $0x11d0] sm:$0xff]  ;;  %v830_v42 = vld [vmem:[#allocation8 + $0x7f8] sm:$0xff] }
 0x2aa   :  { %2470 = vmatprep.subr.bf16.mxu1 %v2469_v61  ;;  %2542 = vmatprep.subr.bf16.mxu0 %v2541_v62  ;;  %v1104_v61 = vld [vmem:[#allocation8 + $0x1088] sm:$0xff]  ;;  %v1110_v62 = vld [vmem:[#allocation8 + $0x10b8] sm:$0xff] }
 0x2ab   :  { %v836_v43 = vld [vmem:[#allocation8 + $0x828] sm:$0xff] }
 0x2ad   :  { %2472 = vmatpush1.bf16.msra.mxu1 %v2471_v10  ;;  %2544 = vmatpush1.bf16.msra.mxu0 %v2543_v12  ;;  %v2489_v10 = vpack.c.bf16 %v1110_v62, %v1104_v61  ;;  %v2561_v12 = vpack.c.bf16 %v752_v1, %v746_v63  ;;  %v2503_v61 = vpack.c.bf16 %v1145_v52, %v1139_v51  ;;  %v835_v51 = vld [vmem:[#allocation8 + $0x820] sm:$0xff]  ;;  %v628_v52 = vld [vmem:[#allocation8 + $0x1a8] sm:$0xff] }
 0x2ae   :  { %2474 = vmatprep.subr.bf16.mxu1 %v2473_v18  ;;  %2546 = vmatprep.subr.bf16.mxu0 %v2545_v20  ;;  %v1116_v18 = vld [vmem:[#allocation8 + $0x10e8] sm:$0xff]  ;;  %v1122_v20 = vld [vmem:[#allocation8 + $0x1118] sm:$0xff]  ;;  %v2577_v1 = vpack.c.bf16 %v800_v59, %v794_v58  ;;  %v627_v58 = vld [vmem:[#allocation8 + $0x1a0] sm:$0xff] }
 0x2af   :  { %v633_v59 = vld [vmem:[#allocation8 + $0x1d0] sm:$0xff] }
 0x2b1   :  { %2476 = vmatpush1.bf16.msra.mxu1 %v2475_v27  ;;  %2548 = vmatpush1.bf16.msra.mxu0 %v2547_v28  ;;  %v2493_v27 = vpack.c.bf16 %v1122_v20, %v1116_v18  ;;  %v2565_v28 = vpack.c.bf16 %v764_v22, %v758_v21  ;;  %v2579_v20 = vpack.c.bf16 %v799_v8, %v793_v7  ;;  %v591_v22 = vld [vmem:[#allocation8 + $0x80] sm:$0xff]  ;;  %v860_v7 = vld [vmem:[#allocation8 + $0x8e8] sm:$0xff] }
 0x2b2   :  { %2478 = vmatprep.subr.bf16.mxu1 %v2477_v31  ;;  %2550 = vmatprep.subr.bf16.mxu0 %v2549_v32  ;;  %v1128_v31 = vld [vmem:[#allocation8 + $0x1148] sm:$0xff]  ;;  %v1134_v32 = vld [vmem:[#allocation8 + $0x1178] sm:$0xff]  ;;  %v2715_v8 = vpack.c.bf16 %v633_v59, %v627_v58 }
 0x2b3   :  { %v2497_v40 = vpack.c.bf16 %v1134_v32, %v1128_v31  ;;  %v688_v58 = vld [vmem:[#allocation8 + $0x388] sm:$0xff]  ;;  %v694_v59 = vld [vmem:[#allocation8 + $0x3b8] sm:$0xff] }
 0x2b5   :  { %2480 = vmatpush1.bf16.msra.mxu1 %v2479_v48  ;;  %2552 = vmatpush1.bf16.msra.mxu0 %v2551_v39  ;;  %v1133_v48 = vld [vmem:[#allocation8 + $0x1170] sm:$0xff]  ;;  %v2569_v39 = vpack.c.bf16 %v776_v34, %v770_v33  ;;  %v603_v34 = vld [vmem:[#allocation8 + $0xe0] sm:$0xff] }
 0x2b6   :  { %2482 = vmatprep.subr.bf16.mxu1 %v2481_v44  ;;  %2554 = vmatprep.subr.bf16.mxu0 %v2553_v45  ;;  %v1140_v44 = vld [vmem:[#allocation8 + $0x11a8] sm:$0xff]  ;;  %v1146_v45 = vld [vmem:[#allocation8 + $0x11d8] sm:$0xff]  ;;  %v2499_v49 = vpack.c.bf16 %v1133_v48, %v1127_v38  ;;  %v2585_v38 = vpack.c.bf16 %v824_v30, %v818_v29  ;;  %v651_v29 = vld [vmem:[#allocation8 + $0x260] sm:$0xff] }
 0x2b7   :  { %v616_v48 = vld [vmem:[#allocation8 + $0x148] sm:$0xff]  ;;  %v657_v30 = vld [vmem:[#allocation8 + $0x290] sm:$0xff] }
 0x2b9   :  { %2484 = vmatpush1.bf16.msra.mxu1 %v2483_v0  ;;  %2556 = vmatpush1.bf16.msra.mxu0 %v2555_v53  ;;  %v2501_v0 = vpack.c.bf16 %v1146_v45, %v1140_v44  ;;  %v781_v53 = vld [vmem:[#allocation8 + $0x670] sm:$0xff] }
 0x2ba   :  { %2486 = vmatprep.subr.bf16.mxu1 %v2485_v56  ;;  %2558 = vmatprep.subr.bf16.mxu0 %v2557_v57  ;;  %v2573_v56 = vpack.c.bf16 %v788_v47, %v782_v46  ;;  %v586_v57 = vld [vmem:[#allocation8 + $0x58] sm:$0xff]  ;;  %v2575_v62 = vpack.c.bf16 %v787_v54, %v781_v53  ;;  %v615_v46 = vld [vmem:[#allocation8 + $0x140] sm:$0xff]  ;;  %v621_v47 = vld [vmem:[#allocation8 + $0x170] sm:$0xff] }
 0x2bb   :  { %v2697_v63 = vpack.c.bf16 %v586_v57, %v580_v55  ;;  %v842_v53 = vld [vmem:[#allocation8 + $0x858] sm:$0xff]  ;;  %v848_v54 = vld [vmem:[#allocation8 + $0x888] sm:$0xff]  ;;  %v2711_v55 = vpack.c.bf16 %v621_v47, %v615_v46 }
 0x2bc   :  { %v676_v46 = vld [vmem:[#allocation8 + $0x328] sm:$0xff]  ;;  %v682_v47 = vld [vmem:[#allocation8 + $0x358] sm:$0xff] }
 0x2bd   :  { %2488 = vmatpush1.bf16.msra.mxu1 %v2487_v5  ;;  %2560 = vmatpush1.bf16.msra.mxu0 %v2559_v6  ;;  %v579_v5 = vld [vmem:[#allocation8 + $0x20] sm:$0xff]  ;;  %v585_v6 = vld [vmem:[#allocation8 + $0x50] sm:$0xff] }
 0x2be   :  { %2490 = vmatprep.subr.bf16.mxu1 %v2489_v10  ;;  %2562 = vmatprep.subr.bf16.mxu0 %v2561_v12  ;;  %v592_v10 = vld [vmem:[#allocation8 + $0x88] sm:$0xff]  ;;  %v598_v12 = vld [vmem:[#allocation8 + $0xb8] sm:$0xff]  ;;  %v2699_v18 = vpack.c.bf16 %v585_v6, %v579_v5 }
 0x2bf   :  { %v2701_v21 = vpack.c.bf16 %v598_v12, %v592_v10  ;;  %v646_v5 = vld [vmem:[#allocation8 + $0x238] sm:$0xff] }
 0x2c0   :  { %v854_v6 = vld [vmem:[#allocation8 + $0x8b8] sm:$0xff] }
 0x2c1   :  { %2492 = vmatpush1.bf16.msra.mxu1 %v2491_v23  ;;  %2564 = vmatpush1.bf16.msra.mxu0 %v2563_v24  ;;  %v597_v23 = vld [vmem:[#allocation8 + $0xb0] sm:$0xff] }
 0x2c2   :  { %2494 = vmatprep.subr.bf16.mxu1 %v2493_v27  ;;  %2566 = vmatprep.subr.bf16.mxu0 %v2565_v28  ;;  %v805_v24 = vld [vmem:[#allocation8 + $0x730] sm:$0xff]  ;;  %v604_v27 = vld [vmem:[#allocation8 + $0xe8] sm:$0xff]  ;;  %v610_v28 = vld [vmem:[#allocation8 + $0x118] sm:$0xff]  ;;  %v2703_v31 = vpack.c.bf16 %v597_v23, %v591_v22 }
 0x2c3   :  { %v2583_v32 = vpack.c.bf16 %v811_v26, %v805_v24  ;;  %v2705_v33 = vpack.c.bf16 %v610_v28, %v604_v27  ;;  %v652_v22 = vld [vmem:[#allocation8 + $0x268] sm:$0xff]  ;;  %v658_v23 = vld [vmem:[#allocation8 + $0x298] sm:$0xff]  ;;  %v2719_v26 = vpack.c.bf16 %v645_v15, %v639_v14 }
 0x2c4   :  { %v866_v24 = vld [vmem:[#allocation8 + $0x918] sm:$0xff]  ;;  %v2721_v28 = vpack.c.bf16 %v658_v23, %v652_v22  ;;  %v700_v14 = vld [vmem:[#allocation8 + $0x3e8] sm:$0xff] }
 0x2c5   :  { %2496 = vmatpush1.bf16.msra.mxu1 %v2495_v36  ;;  %2568 = vmatpush1.bf16.msra.mxu0 %v2567_v37  ;;  %v609_v36 = vld [vmem:[#allocation8 + $0x110] sm:$0xff]  ;;  %v706_v15 = vld [vmem:[#allocation8 + $0x418] sm:$0xff] }
 0x2c6   :  { %2498 = vmatprep.subr.bf16.mxu1 %v2497_v40  ;;  %2570 = vmatprep.subr.bf16.mxu0 %v2569_v39  ;;  %v817_v37 = vld [vmem:[#allocation8 + $0x790] sm:$0xff]  ;;  %v823_v40 = vld [vmem:[#allocation8 + $0x7c0] sm:$0xff]  ;;  %v622_v39 = vld [vmem:[#allocation8 + $0x178] sm:$0xff]  ;;  %v2707_v44 = vpack.c.bf16 %v609_v36, %v603_v34  ;;  %v2737_v23 = vpack.c.bf16 %v706_v15, %v700_v14 }
 0x2c7   :  { %v2709_v45 = vpack.c.bf16 %v622_v39, %v616_v48  ;;  %v664_v34 = vld [vmem:[#allocation8 + $0x2c8] sm:$0xff]  ;;  %v670_v36 = vld [vmem:[#allocation8 + $0x2f8] sm:$0xff] }
 0x2c8   :  { %1461 = vmatmul.mubr.f32.vlgmr.msra.gmra.mrb[2].mxu0 %v3430_v17  ;;  %v2725_v39 = vpack.c.bf16 %v670_v36, %v664_v34 }
 0x2c9   :  { %2500 = vmatpush1.bf16.msra.mxu1 %v2499_v49  ;;  %2572 = vmatpush1.bf16.msra.mxu0 %v2571_v50  ;;  %v829_v49 = vld [vmem:[#allocation8 + $0x7f0] sm:$0xff]  ;;  %v2589_v50 = vpack.c.bf16 %v836_v43, %v830_v42  ;;  %v663_v42 = vld [vmem:[#allocation8 + $0x2c0] sm:$0xff] }
 0x2ca   :  { %1531 = vmatprep.mubr.f32.mxu0 %v3439_v41  ;;  %2502 = vmatprep.subr.bf16.mxu1 %v2501_v0  ;;  %v634_v0 = vld [vmem:[#allocation8 + $0x1d8] sm:$0xff]  ;;  %v669_v43 = vld [vmem:[#allocation8 + $0x2f0] sm:$0xff] }
 0x2cb   :  { %2574 = vmatprep.subr.bf16.mxu0 %v2573_v56  ;;  %v2591_v56 = vpack.c.bf16 %v835_v51, %v829_v49  ;;  %v2713_v57 = vpack.c.bf16 %v634_v0, %v628_v52  ;;  %v890_v49 = vld [vmem:[#allocation8 + $0x9d8] sm:$0xff]  ;;  %v2727_v51 = vpack.c.bf16 %v669_v43, %v663_v42  ;;  %v2729_v0 = vpack.c.bf16 %v682_v47, %v676_v46  ;;  %v724_v42 = vld [vmem:[#allocation8 + $0x4a8] sm:$0xff] }
 0x2cc   :  { %v730_v43 = vld [vmem:[#allocation8 + $0x4d8] sm:$0xff] }
 0x2cd   :  { %2504 = vmatpush1.bf16.msra.mxu1 %v2503_v61  ;;  %2576 = vmatpush1.bf16.msra.mxu0 %v2575_v62  ;;  %v841_v61 = vld [vmem:[#allocation8 + $0x850] sm:$0xff]  ;;  %v2593_v62 = vpack.c.bf16 %v848_v54, %v842_v53  ;;  %v675_v53 = vld [vmem:[#allocation8 + $0x320] sm:$0xff]  ;;  %v2745_v47 = vpack.c.bf16 %v730_v43, %v724_v42 }
 0x2ce   :  { %2698 = vmatprep.subr.bf16.mxu1 %v2697_v63  ;;  %2578 = vmatprep.subr.bf16.mxu0 %v2577_v1  ;;  %v847_v63 = vld [vmem:[#allocation8 + $0x880] sm:$0xff]  ;;  %v640_v1 = vld [vmem:[#allocation8 + $0x208] sm:$0xff]  ;;  %v681_v54 = vld [vmem:[#allocation8 + $0x350] sm:$0xff] }
 0x2cf   :  { %v2595_v10 = vpack.c.bf16 %v847_v63, %v841_v61  ;;  %v2717_v12 = vpack.c.bf16 %v646_v5, %v640_v1  ;;  %v902_v61 = vld [vmem:[#allocation8 + $0xa38] sm:$0xff]  ;;  %v2731_v63 = vpack.c.bf16 %v681_v54, %v675_v53  ;;  %v2733_v5 = vpack.c.bf16 %v694_v59, %v688_v58  ;;  %v736_v53 = vld [vmem:[#allocation8 + $0x508] sm:$0xff] }
 0x2d0   :  { %1390 = vmatmul.mubr.f32.vlgmr.msra.gmra.mrb[6].mxu1 %v3443_v60  ;;  %v742_v54 = vld [vmem:[#allocation8 + $0x538] sm:$0xff] }
 0x2d1   :  { %2700 = vmatpush1.bf16.msra.mxu1 %v2699_v18  ;;  %1673 = vmatprep.mubr.f32.mxu1 %v3432_v19  ;;  %v2587_v19 = vpack.c.bf16 %v823_v40, %v817_v37  ;;  %v853_v18 = vld [vmem:[#allocation8 + $0x8b0] sm:$0xff]  ;;  %v878_v37 = vld [vmem:[#allocation8 + $0x978] sm:$0xff]  ;;  %v2723_v40 = vpack.c.bf16 %v657_v30, %v651_v29  ;;  %v712_v29 = vld [vmem:[#allocation8 + $0x448] sm:$0xff]  ;;  %v2749_v59 = vpack.c.bf16 %v742_v54, %v736_v53 }
 0x2d2   :  { %2580 = vmatpush1.bf16.msra.mxu0 %v2579_v20  ;;  %2702 = vmatprep.subr.bf16.mxu1 %v2701_v21  ;;  %v2597_v20 = vpack.c.bf16 %v860_v7, %v854_v6  ;;  %v859_v21 = vld [vmem:[#allocation8 + $0x8e0] sm:$0xff]  ;;  %v693_v7 = vld [vmem:[#allocation8 + $0x3b0] sm:$0xff]  ;;  %v718_v30 = vld [vmem:[#allocation8 + $0x478] sm:$0xff] }
 0x2d3   :  { %2582 = vmatprep.subr.bf16.mxu0 %v2581_v25  ;;  %v872_v25 = vld [vmem:[#allocation8 + $0x948] sm:$0xff]  ;;  %v2599_v27 = vpack.c.bf16 %v859_v21, %v853_v18  ;;  %v687_v6 = vld [vmem:[#allocation8 + $0x380] sm:$0xff]  ;;  %v914_v18 = vld [vmem:[#allocation8 + $0xa98] sm:$0xff]  ;;  %v2741_v36 = vpack.c.bf16 %v718_v30, %v712_v29 }
 0x2d4   :  { %v2735_v21 = vpack.c.bf16 %v693_v7, %v687_v6  ;;  %v748_v6 = vld [vmem:[#allocation8 + $0x568] sm:$0xff]  ;;  %v754_v7 = vld [vmem:[#allocation8 + $0x598] sm:$0xff]  ;;  %v759_v30 = vld [vmem:[#allocation8 + $0x5c0] sm:$0xff] }
 0x2d5   :  { %2704 = vmatpush1.bf16.msra.mxu1 %v2703_v31  ;;  %v865_v31 = vld [vmem:[#allocation8 + $0x910] sm:$0xff]  ;;  %v2753_v15 = vpack.c.bf16 %v754_v7, %v748_v6 }
 0x2d6   :  { %2584 = vmatpush1.bf16.msra.mxu0 %v2583_v32  ;;  %2706 = vmatprep.subr.bf16.mxu1 %v2705_v33  ;;  %v2601_v32 = vpack.c.bf16 %v872_v25, %v866_v24  ;;  %v871_v33 = vld [vmem:[#allocation8 + $0x940] sm:$0xff]  ;;  %v705_v25 = vld [vmem:[#allocation8 + $0x410] sm:$0xff] }
 0x2d7   :  { %2586 = vmatprep.subr.bf16.mxu0 %v2585_v38  ;;  %v884_v38 = vld [vmem:[#allocation8 + $0x9a8] sm:$0xff]  ;;  %v2603_v48 = vpack.c.bf16 %v871_v33, %v865_v31  ;;  %v699_v24 = vld [vmem:[#allocation8 + $0x3e0] sm:$0xff]  ;;  %v926_v31 = vld [vmem:[#allocation8 + $0xaf8] sm:$0xff] }
 0x2d8   :  { %v2739_v33 = vpack.c.bf16 %v705_v25, %v699_v24  ;;  %v760_v24 = vld [vmem:[#allocation8 + $0x5c8] sm:$0xff]  ;;  %v766_v25 = vld [vmem:[#allocation8 + $0x5f8] sm:$0xff] }
 0x2d9   :  { %2708 = vmatpush1.bf16.msra.mxu1 %v2707_v44  ;;  %v877_v44 = vld [vmem:[#allocation8 + $0x970] sm:$0xff] }
 0x2da   :  { %2588 = vmatpush1.bf16.msra.mxu0 %v2587_v19  ;;  %2710 = vmatprep.subr.bf16.mxu1 %v2709_v45  ;;  %v2605_v19 = vpack.c.bf16 %v884_v38, %v878_v37  ;;  %v883_v45 = vld [vmem:[#allocation8 + $0x9a0] sm:$0xff]  ;;  %v717_v38 = vld [vmem:[#allocation8 + $0x470] sm:$0xff] }
 0x2db   :  { %2590 = vmatprep.subr.bf16.mxu0 %v2589_v50  ;;  %v896_v50 = vld [vmem:[#allocation8 + $0xa08] sm:$0xff]  ;;  %v2607_v52 = vpack.c.bf16 %v883_v45, %v877_v44  ;;  %v711_v37 = vld [vmem:[#allocation8 + $0x440] sm:$0xff]  ;;  %v938_v44 = vld [vmem:[#allocation8 + $0xb58] sm:$0xff] }
 0x2dc   :  { %v2743_v45 = vpack.c.bf16 %v717_v38, %v711_v37  ;;  %v772_v37 = vld [vmem:[#allocation8 + $0x628] sm:$0xff]  ;;  %v778_v38 = vld [vmem:[#allocation8 + $0x658] sm:$0xff] }
 0x2dd   :  { %2712 = vmatpush1.bf16.msra.mxu1 %v2711_v55  ;;  %v889_v55 = vld [vmem:[#allocation8 + $0x9d0] sm:$0xff]  ;;  %v2761_v43 = vpack.c.bf16 %v778_v38, %v772_v37  ;;  %v819_v37 = vld [vmem:[#allocation8 + $0x7a0] sm:$0xff] }
 0x2de   :  { %2592 = vmatpush1.bf16.msra.mxu0 %v2591_v56  ;;  %2714 = vmatprep.subr.bf16.mxu1 %v2713_v57  ;;  %v2609_v56 = vpack.c.bf16 %v896_v50, %v890_v49  ;;  %v895_v57 = vld [vmem:[#allocation8 + $0xa00] sm:$0xff]  ;;  %v729_v50 = vld [vmem:[#allocation8 + $0x4d0] sm:$0xff] }
 0x2df   :  { %2594 = vmatprep.subr.bf16.mxu0 %v2593_v62  ;;  %v908_v62 = vld [vmem:[#allocation8 + $0xa68] sm:$0xff]  ;;  %v2611_v1 = vpack.c.bf16 %v895_v57, %v889_v55  ;;  %v723_v49 = vld [vmem:[#allocation8 + $0x4a0] sm:$0xff]  ;;  %v950_v55 = vld [vmem:[#allocation8 + $0xbb8] sm:$0xff] }
 0x2e0   :  { %v2747_v57 = vpack.c.bf16 %v729_v50, %v723_v49  ;;  %v784_v49 = vld [vmem:[#allocation8 + $0x688] sm:$0xff]  ;;  %v790_v50 = vld [vmem:[#allocation8 + $0x6b8] sm:$0xff]  ;;  %v825_v38 = vld [vmem:[#allocation8 + $0x7d0] sm:$0xff] }
 0x2e1   :  { %2716 = vmatpush1.bf16.msra.mxu1 %v2715_v8  ;;  %v901_v8 = vld [vmem:[#allocation8 + $0xa30] sm:$0xff]  ;;  %v2765_v54 = vpack.c.bf16 %v790_v50, %v784_v49  ;;  %v831_v49 = vld [vmem:[#allocation8 + $0x800] sm:$0xff] }
 0x2e2   :  { %2596 = vmatpush1.bf16.msra.mxu0 %v2595_v10  ;;  %2718 = vmatprep.subr.bf16.mxu1 %v2717_v12  ;;  %v2613_v10 = vpack.c.bf16 %v908_v62, %v902_v61  ;;  %v907_v12 = vld [vmem:[#allocation8 + $0xa60] sm:$0xff]  ;;  %v741_v62 = vld [vmem:[#allocation8 + $0x530] sm:$0xff] }
 0x2e3   :  { %2598 = vmatprep.subr.bf16.mxu0 %v2597_v20  ;;  %v920_v20 = vld [vmem:[#allocation8 + $0xac8] sm:$0xff]  ;;  %v2615_v22 = vpack.c.bf16 %v907_v12, %v901_v8  ;;  %v735_v61 = vld [vmem:[#allocation8 + $0x500] sm:$0xff]  ;;  %v962_v8 = vld [vmem:[#allocation8 + $0xc18] sm:$0xff] }
 0x2e4   :  { %v2751_v12 = vpack.c.bf16 %v741_v62, %v735_v61  ;;  %v796_v61 = vld [vmem:[#allocation8 + $0x6e8] sm:$0xff]  ;;  %v802_v62 = vld [vmem:[#allocation8 + $0x718] sm:$0xff]  ;;  %v837_v50 = vld [vmem:[#allocation8 + $0x830] sm:$0xff] }
 0x2e5   :  { %2720 = vmatpush1.bf16.msra.mxu1 %v2719_v26  ;;  %v913_v26 = vld [vmem:[#allocation8 + $0xa90] sm:$0xff]  ;;  %v2769_v7 = vpack.c.bf16 %v802_v62, %v796_v61  ;;  %v843_v61 = vld [vmem:[#allocation8 + $0x860] sm:$0xff] }
 0x2e6   :  { %2600 = vmatpush1.bf16.msra.mxu0 %v2599_v27  ;;  %2722 = vmatprep.subr.bf16.mxu1 %v2721_v28  ;;  %v2617_v27 = vpack.c.bf16 %v920_v20, %v914_v18  ;;  %v919_v28 = vld [vmem:[#allocation8 + $0xac0] sm:$0xff]  ;;  %v753_v20 = vld [vmem:[#allocation8 + $0x590] sm:$0xff] }
 0x2e7   :  { %2602 = vmatprep.subr.bf16.mxu0 %v2601_v32  ;;  %v932_v32 = vld [vmem:[#allocation8 + $0xb28] sm:$0xff]  ;;  %v2619_v34 = vpack.c.bf16 %v919_v28, %v913_v26  ;;  %v747_v18 = vld [vmem:[#allocation8 + $0x560] sm:$0xff]  ;;  %v974_v26 = vld [vmem:[#allocation8 + $0xc78] sm:$0xff] }
 0x2e8   :  { %v2755_v28 = vpack.c.bf16 %v753_v20, %v747_v18  ;;  %v808_v18 = vld [vmem:[#allocation8 + $0x748] sm:$0xff]  ;;  %v814_v20 = vld [vmem:[#allocation8 + $0x778] sm:$0xff]  ;;  %v849_v62 = vld [vmem:[#allocation8 + $0x890] sm:$0xff] }
 0x2e9   :  { %2724 = vmatpush1.bf16.msra.mxu1 %v2723_v40  ;;  %v925_v40 = vld [vmem:[#allocation8 + $0xaf0] sm:$0xff] }
 0x2ea   :  { %2604 = vmatpush1.bf16.msra.mxu0 %v2603_v48  ;;  %2726 = vmatprep.subr.bf16.mxu1 %v2725_v39  ;;  %v2621_v48 = vpack.c.bf16 %v932_v32, %v926_v31  ;;  %v931_v39 = vld [vmem:[#allocation8 + $0xb20] sm:$0xff]  ;;  %v765_v31 = vld [vmem:[#allocation8 + $0x5f0] sm:$0xff] }
 0x2eb   :  { %2606 = vmatprep.subr.bf16.mxu0 %v2605_v19  ;;  %v944_v19 = vld [vmem:[#allocation8 + $0xb88] sm:$0xff]  ;;  %v2623_v46 = vpack.c.bf16 %v931_v39, %v925_v40  ;;  %v973_v32 = vld [vmem:[#allocation8 + $0xc70] sm:$0xff]  ;;  %v986_v40 = vld [vmem:[#allocation8 + $0xcd8] sm:$0xff]  ;;  %v2759_v39 = vpack.c.bf16 %v765_v31, %v759_v30 }
 0x2ec   :  { %v826_v30 = vld [vmem:[#allocation8 + $0x7d8] sm:$0xff] }
 0x2ed   :  { %2728 = vmatpush1.bf16.msra.mxu1 %v2727_v51  ;;  %v937_v51 = vld [vmem:[#allocation8 + $0xb50] sm:$0xff]  ;;  %v1034_v31 = vld [vmem:[#allocation8 + $0xe58] sm:$0xff] }
 0x2ee   :  { %2608 = vmatpush1.bf16.msra.mxu0 %v2607_v52  ;;  %2730 = vmatprep.subr.bf16.mxu1 %v2729_v0  ;;  %v2625_v52 = vpack.c.bf16 %v944_v19, %v938_v44  ;;  %v943_v0 = vld [vmem:[#allocation8 + $0xb80] sm:$0xff]  ;;  %v777_v19 = vld [vmem:[#allocation8 + $0x650] sm:$0xff] }
 0x2ef   :  { %2610 = vmatprep.subr.bf16.mxu0 %v2609_v56  ;;  %v956_v56 = vld [vmem:[#allocation8 + $0xbe8] sm:$0xff]  ;;  %v2627_v58 = vpack.c.bf16 %v943_v0, %v937_v51  ;;  %v771_v44 = vld [vmem:[#allocation8 + $0x620] sm:$0xff]  ;;  %v998_v51 = vld [vmem:[#allocation8 + $0xd38] sm:$0xff] }
 0x2f0   :  { %v2763_v0 = vpack.c.bf16 %v777_v19, %v771_v44  ;;  %v1046_v44 = vld [vmem:[#allocation8 + $0xeb8] sm:$0xff]  ;;  %v1052_v19 = vld [vmem:[#allocation8 + $0xee8] sm:$0xff] }
 0x2f1   :  { %2732 = vmatpush1.bf16.msra.mxu1 %v2731_v63  ;;  %v949_v63 = vld [vmem:[#allocation8 + $0xbb0] sm:$0xff] }
 0x2f2   :  { %2612 = vmatpush1.bf16.msra.mxu0 %v2611_v1  ;;  %2734 = vmatprep.subr.bf16.mxu1 %v2733_v5  ;;  %v2629_v1 = vpack.c.bf16 %v956_v56, %v950_v55  ;;  %v955_v5 = vld [vmem:[#allocation8 + $0xbe0] sm:$0xff]  ;;  %v789_v56 = vld [vmem:[#allocation8 + $0x6b0] sm:$0xff] }
 0x2f3   :  { %2614 = vmatprep.subr.bf16.mxu0 %v2613_v10  ;;  %v968_v10 = vld [vmem:[#allocation8 + $0xc48] sm:$0xff]  ;;  %v2631_v14 = vpack.c.bf16 %v955_v5, %v949_v63  ;;  %v783_v55 = vld [vmem:[#allocation8 + $0x680] sm:$0xff]  ;;  %v1010_v63 = vld [vmem:[#allocation8 + $0xd98] sm:$0xff] }
 0x2f4   :  { %v2767_v5 = vpack.c.bf16 %v789_v56, %v783_v55  ;;  %v1058_v55 = vld [vmem:[#allocation8 + $0xf18] sm:$0xff]  ;;  %v1064_v56 = vld [vmem:[#allocation8 + $0xf48] sm:$0xff] }
 0x2f5   :  { %2736 = vmatpush1.bf16.msra.mxu1 %v2735_v21  ;;  %v2633_v21 = vpack.c.bf16 %v968_v10, %v962_v8  ;;  %v795_v8 = vld [vmem:[#allocation8 + $0x6e0] sm:$0xff]  ;;  %v801_v10 = vld [vmem:[#allocation8 + $0x710] sm:$0xff] }
 0x2f6   :  { %2616 = vmatpush1.bf16.msra.mxu0 %v2615_v22  ;;  %2738 = vmatprep.subr.bf16.mxu1 %v2737_v23  ;;  %v961_v22 = vld [vmem:[#allocation8 + $0xc10] sm:$0xff]  ;;  %v967_v23 = vld [vmem:[#allocation8 + $0xc40] sm:$0xff] }
 0x2f7   :  { %2618 = vmatprep.subr.bf16.mxu0 %v2617_v27  ;;  %v980_v27 = vld [vmem:[#allocation8 + $0xca8] sm:$0xff]  ;;  %v2635_v29 = vpack.c.bf16 %v967_v23, %v961_v22  ;;  %v2771_v22 = vpack.c.bf16 %v801_v10, %v795_v8  ;;  %v2773_v23 = vpack.c.bf16 %v814_v20, %v808_v18  ;;  %v1070_v8 = vld [vmem:[#allocation8 + $0xf78] sm:$0xff]  ;;  %v855_v18 = vld [vmem:[#allocation8 + $0x8c0] sm:$0xff] }
 0x2f8   :  { %v1076_v10 = vld [vmem:[#allocation8 + $0xfa8] sm:$0xff]  ;;  %v861_v20 = vld [vmem:[#allocation8 + $0x8f0] sm:$0xff] }
 0x2f9   :  { %2740 = vmatpush1.bf16.msra.mxu1 %v2739_v33  ;;  %v2757_v33 = vpack.c.bf16 %v766_v25, %v760_v24  ;;  %v807_v24 = vld [vmem:[#allocation8 + $0x740] sm:$0xff]  ;;  %v813_v25 = vld [vmem:[#allocation8 + $0x770] sm:$0xff] }
 0x2fa   :  { %2620 = vmatpush1.bf16.msra.mxu0 %v2619_v34  ;;  %2742 = vmatprep.subr.bf16.mxu1 %v2741_v36  ;;  %v2637_v34 = vpack.c.bf16 %v980_v27, %v974_v26  ;;  %v979_v36 = vld [vmem:[#allocation8 + $0xca0] sm:$0xff]  ;;  %v1021_v26 = vld [vmem:[#allocation8 + $0xdf0] sm:$0xff] }
 0x2fb   :  { %2622 = vmatprep.subr.bf16.mxu0 %v2621_v48  ;;  %v992_v48 = vld [vmem:[#allocation8 + $0xd08] sm:$0xff]  ;;  %v2639_v42 = vpack.c.bf16 %v979_v36, %v973_v32 }
 0x2fc   :  { %v1040_v32 = vld [vmem:[#allocation8 + $0xe88] sm:$0xff] }
 0x2fd   :  { %2744 = vmatpush1.bf16.msra.mxu1 %v2743_v45  ;;  %v985_v45 = vld [vmem:[#allocation8 + $0xcd0] sm:$0xff] }
 0x2fe   :  { %2624 = vmatpush1.bf16.msra.mxu0 %v2623_v46  ;;  %2746 = vmatprep.subr.bf16.mxu1 %v2745_v47  ;;  %v2641_v46 = vpack.c.bf16 %v992_v48, %v986_v40  ;;  %v991_v47 = vld [vmem:[#allocation8 + $0xd00] sm:$0xff]  ;;  %v1033_v40 = vld [vmem:[#allocation8 + $0xe50] sm:$0xff]  ;;  %v2657_v48 = vpack.c.bf16 %v1040_v32, %v1034_v31 }
 0x2ff   :  { %2626 = vmatprep.subr.bf16.mxu0 %v2625_v52  ;;  %v1004_v52 = vld [vmem:[#allocation8 + $0xd68] sm:$0xff]  ;;  %v2643_v53 = vpack.c.bf16 %v991_v47, %v985_v45  ;;  %v2779_v45 = vpack.c.bf16 %v825_v38, %v819_v37  ;;  %v1081_v31 = vld [vmem:[#allocation8 + $0xfd0] sm:$0xff]  ;;  %v1094_v37 = vld [vmem:[#allocation8 + $0x1038] sm:$0xff] }
 0x300   :  { %v1100_v38 = vld [vmem:[#allocation8 + $0x1068] sm:$0xff] }
 0x301   :  { %2748 = vmatpush1.bf16.msra.mxu1 %v2747_v57  ;;  %v997_v57 = vld [vmem:[#allocation8 + $0xd30] sm:$0xff] }
 0x302   :  { %2628 = vmatpush1.bf16.msra.mxu0 %v2627_v58  ;;  %2750 = vmatprep.subr.bf16.mxu1 %v2749_v59  ;;  %v2645_v58 = vpack.c.bf16 %v1004_v52, %v998_v51  ;;  %v1003_v59 = vld [vmem:[#allocation8 + $0xd60] sm:$0xff]  ;;  %v1045_v51 = vld [vmem:[#allocation8 + $0xeb0] sm:$0xff]  ;;  %v2661_v52 = vpack.c.bf16 %v1052_v19, %v1046_v44  ;;  %v2677_v19 = vpack.c.bf16 %v1100_v38, %v1094_v37 }
 0x303   :  { %2630 = vmatprep.subr.bf16.mxu0 %v2629_v1  ;;  %v1016_v1 = vld [vmem:[#allocation8 + $0xdc8] sm:$0xff]  ;;  %v2647_v6 = vpack.c.bf16 %v1003_v59, %v997_v57  ;;  %v2783_v57 = vpack.c.bf16 %v837_v50, %v831_v49  ;;  %v1093_v44 = vld [vmem:[#allocation8 + $0x1030] sm:$0xff]  ;;  %v1106_v49 = vld [vmem:[#allocation8 + $0x1098] sm:$0xff] }
 0x304   :  { %v1112_v50 = vld [vmem:[#allocation8 + $0x10c8] sm:$0xff]  ;;  %v1141_v37 = vld [vmem:[#allocation8 + $0x11b0] sm:$0xff] }
 0x305   :  { %2752 = vmatpush1.bf16.msra.mxu1 %v2751_v12  ;;  %v1009_v12 = vld [vmem:[#allocation8 + $0xd90] sm:$0xff] }
 0x306   :  { %2632 = vmatpush1.bf16.msra.mxu0 %v2631_v14  ;;  %2754 = vmatprep.subr.bf16.mxu1 %v2753_v15  ;;  %v2649_v14 = vpack.c.bf16 %v1016_v1, %v1010_v63  ;;  %v1015_v15 = vld [vmem:[#allocation8 + $0xdc0] sm:$0xff]  ;;  %v1057_v63 = vld [vmem:[#allocation8 + $0xf10] sm:$0xff]  ;;  %v2665_v1 = vpack.c.bf16 %v1064_v56, %v1058_v55  ;;  %v2681_v56 = vpack.c.bf16 %v1112_v50, %v1106_v49  ;;  %v952_v49 = vld [vmem:[#allocation8 + $0xbc8] sm:$0xff] }
 0x307   :  { %2634 = vmatprep.subr.bf16.mxu0 %v2633_v21  ;;  %v1022_v21 = vld [vmem:[#allocation8 + $0xdf8] sm:$0xff]  ;;  %v1105_v55 = vld [vmem:[#allocation8 + $0x1090] sm:$0xff] }
 0x308   :  { %v958_v50 = vld [vmem:[#allocation8 + $0xbf8] sm:$0xff] }
 0x309   :  { %1532 = vmatmul.mubr.f32.vlgmr.msra.gmra.mrb[2].mxu0 %v3437_v35  ;;  %2756 = vmatpush1.bf16.msra.mxu1 %v2755_v28  ;;  %v1027_v28 = vld [vmem:[#allocation8 + $0xe20] sm:$0xff] }
 0x30a   :  { %2636 = vmatpush1.bf16.msra.mxu0 %v2635_v29  ;;  %1602 = vmatprep.mubr.f32.mxu0 %v3445_v4  ;;  %v820_v29 = vld [vmem:[#allocation8 + $0x7a8] sm:$0xff] }
 0x30b   :  { %2758 = vmatprep.subr.bf16.mxu1 %v2757_v33  ;;  %2638 = vmatprep.subr.bf16.mxu0 %v2637_v34  ;;  %v2775_v33 = vpack.c.bf16 %v813_v25, %v807_v24  ;;  %v2655_v34 = vpack.c.bf16 %v1027_v28, %v1021_v26  ;;  %v2777_v36 = vpack.c.bf16 %v826_v30, %v820_v29  ;;  %v1082_v24 = vld [vmem:[#allocation8 + $0xfd8] sm:$0xff]  ;;  %v1088_v25 = vld [vmem:[#allocation8 + $0x1008] sm:$0xff]  ;;  %v867_v29 = vld [vmem:[#allocation8 + $0x920] sm:$0xff] }
 0x30c   :  { %v2791_v26 = vpack.c.bf16 %v861_v20, %v855_v18  ;;  %v873_v30 = vld [vmem:[#allocation8 + $0x950] sm:$0xff]  ;;  %v2673_v32 = vpack.c.bf16 %v1088_v25, %v1082_v24  ;;  %v1130_v18 = vld [vmem:[#allocation8 + $0x1158] sm:$0xff]  ;;  %v1136_v20 = vld [vmem:[#allocation8 + $0x1188] sm:$0xff] }
 0x30d   :  { %2760 = vmatpush1.bf16.msra.mxu1 %v2759_v39  ;;  %v1039_v39 = vld [vmem:[#allocation8 + $0xe80] sm:$0xff]  ;;  %v1129_v24 = vld [vmem:[#allocation8 + $0x1150] sm:$0xff]  ;;  %v2689_v25 = vpack.c.bf16 %v1136_v20, %v1130_v18  ;;  %v982_v20 = vld [vmem:[#allocation8 + $0xcb8] sm:$0xff] }
 0x30e   :  { %2640 = vmatpush1.bf16.msra.mxu0 %v2639_v42  ;;  %2762 = vmatprep.subr.bf16.mxu1 %v2761_v43  ;;  %v832_v42 = vld [vmem:[#allocation8 + $0x808] sm:$0xff]  ;;  %v838_v43 = vld [vmem:[#allocation8 + $0x838] sm:$0xff] }
 0x30f   :  { %2642 = vmatprep.subr.bf16.mxu0 %v2641_v46  ;;  %v2659_v46 = vpack.c.bf16 %v1039_v39, %v1033_v40  ;;  %v2781_v47 = vpack.c.bf16 %v838_v43, %v832_v42  ;;  %v2795_v40 = vpack.c.bf16 %v873_v30, %v867_v29  ;;  %v879_v42 = vld [vmem:[#allocation8 + $0x980] sm:$0xff]  ;;  %v885_v43 = vld [vmem:[#allocation8 + $0x9b0] sm:$0xff]  ;;  %v1142_v29 = vld [vmem:[#allocation8 + $0x11b8] sm:$0xff] }
 0x310   :  { %1674 = vmatmul.mubr.f32.vlgmr.msra.gmra.mrb[8].mxu1 %v3430_v17  ;;  %v1028_v17 = vld [vmem:[#allocation8 + $0xe28] sm:$0xff] }
 0x311   :  { %2764 = vmatpush1.bf16.msra.mxu1 %v2763_v0  ;;  %1744 = vmatprep.mubr.f32.mxu1 %v3439_v41  ;;  %v2651_v41 = vpack.c.bf16 %v1015_v15, %v1009_v12  ;;  %v2653_v27 = vpack.c.bf16 %v1028_v17, %v1022_v21  ;;  %v1051_v0 = vld [vmem:[#allocation8 + $0xee0] sm:$0xff]  ;;  %v2787_v12 = vpack.c.bf16 %v849_v62, %v843_v61  ;;  %v1069_v21 = vld [vmem:[#allocation8 + $0xf70] sm:$0xff]  ;;  %v1118_v61 = vld [vmem:[#allocation8 + $0x10f8] sm:$0xff] }
 0x312   :  { %2644 = vmatpush1.bf16.msra.mxu0 %v2643_v53  ;;  %2766 = vmatprep.subr.bf16.mxu1 %v2765_v54  ;;  %v844_v53 = vld [vmem:[#allocation8 + $0x868] sm:$0xff]  ;;  %v850_v54 = vld [vmem:[#allocation8 + $0x898] sm:$0xff]  ;;  %v2669_v17 = vpack.c.bf16 %v1076_v10, %v1070_v8  ;;  %v1117_v8 = vld [vmem:[#allocation8 + $0x10f0] sm:$0xff] }
 0x313   :  { %2646 = vmatprep.subr.bf16.mxu0 %v2645_v58  ;;  %v2663_v58 = vpack.c.bf16 %v1051_v0, %v1045_v51  ;;  %v2785_v59 = vpack.c.bf16 %v850_v54, %v844_v53  ;;  %v2799_v51 = vpack.c.bf16 %v885_v43, %v879_v42  ;;  %v891_v53 = vld [vmem:[#allocation8 + $0x9e0] sm:$0xff]  ;;  %v897_v54 = vld [vmem:[#allocation8 + $0xa10] sm:$0xff]  ;;  %v1124_v62 = vld [vmem:[#allocation8 + $0x1128] sm:$0xff] }
 0x314   :  { %v2685_v10 = vpack.c.bf16 %v1124_v62, %v1118_v61  ;;  %v1148_v30 = vld [vmem:[#allocation8 + $0x11e8] sm:$0xff]  ;;  %v970_v62 = vld [vmem:[#allocation8 + $0xc58] sm:$0xff] }
 0x315   :  { %2768 = vmatpush1.bf16.msra.mxu1 %v2767_v5  ;;  %v1063_v5 = vld [vmem:[#allocation8 + $0xf40] sm:$0xff]  ;;  %v2693_v38 = vpack.c.bf16 %v1148_v30, %v1142_v29  ;;  %v1851_v43 = vld [vmem:[#allocation11 + $0x88] sm:$0xff]  ;;  %v994_v30 = vld [vmem:[#allocation8 + $0xd18] sm:$0xff] }
 0x316   :  { %2648 = vmatpush1.bf16.msra.mxu0 %v2647_v6  ;;  %2770 = vmatprep.subr.bf16.mxu1 %v2769_v7  ;;  %v856_v6 = vld [vmem:[#allocation8 + $0x8c8] sm:$0xff]  ;;  %v862_v7 = vld [vmem:[#allocation8 + $0x8f8] sm:$0xff] }
 0x317   :  { %2650 = vmatprep.subr.bf16.mxu0 %v2649_v14  ;;  %v2667_v14 = vpack.c.bf16 %v1063_v5, %v1057_v63  ;;  %v2789_v15 = vpack.c.bf16 %v862_v7, %v856_v6  ;;  %v2803_v63 = vpack.c.bf16 %v897_v54, %v891_v53  ;;  %v903_v6 = vld [vmem:[#allocation8 + $0xa40] sm:$0xff]  ;;  %v909_v7 = vld [vmem:[#allocation8 + $0xa70] sm:$0xff] }
 0x318   :  { %v1850_v42 = vld [vmem:[#allocation11 + $0x80] sm:$0xff]  ;;  %v1852_v53 = vld [vmem:[#allocation11 + $0x90] sm:$0xff]  ;;  %v1853_v54 = vld [vmem:[#allocation11 + $0x98] sm:$0xff] }
 0x319   :  { %2772 = vmatpush1.bf16.msra.mxu1 %v2771_v22  ;;  %v1075_v22 = vld [vmem:[#allocation8 + $0xfa0] sm:$0xff] }
 0x31a   :  { %2652 = vmatpush1.bf16.msra.mxu0 %v2651_v41  ;;  %2774 = vmatprep.subr.bf16.mxu1 %v2773_v23  ;;  %v868_v41 = vld [vmem:[#allocation8 + $0x928] sm:$0xff]  ;;  %v874_v23 = vld [vmem:[#allocation8 + $0x958] sm:$0xff] }
 0x31b   :  { %2654 = vmatprep.subr.bf16.mxu0 %v2653_v27  ;;  %v2671_v27 = vpack.c.bf16 %v1075_v22, %v1069_v21  ;;  %v2793_v28 = vpack.c.bf16 %v874_v23, %v868_v41  ;;  %v2807_v21 = vpack.c.bf16 %v909_v7, %v903_v6  ;;  %v915_v41 = vld [vmem:[#allocation8 + $0xaa0] sm:$0xff]  ;;  %v921_v23 = vld [vmem:[#allocation8 + $0xad0] sm:$0xff] }
 0x31c   :  { %v1854_v6 = vld [vmem:[#allocation11 + $0xa0] sm:$0xff]  ;;  %v1855_v7 = vld [vmem:[#allocation11 + $0xa8] sm:$0xff] }
 0x31d   :  { %2776 = vmatpush1.bf16.msra.mxu1 %v2775_v33  ;;  %v1087_v33 = vld [vmem:[#allocation8 + $0x1000] sm:$0xff] }
 0x31e   :  { %2656 = vmatpush1.bf16.msra.mxu0 %v2655_v34  ;;  %2778 = vmatprep.subr.bf16.mxu1 %v2777_v36  ;;  %v880_v34 = vld [vmem:[#allocation8 + $0x988] sm:$0xff]  ;;  %v886_v36 = vld [vmem:[#allocation8 + $0x9b8] sm:$0xff] }
 0x31f   :  { %2658 = vmatprep.subr.bf16.mxu0 %v2657_v48  ;;  %v2675_v48 = vpack.c.bf16 %v1087_v33, %v1081_v31  ;;  %v2797_v39 = vpack.c.bf16 %v886_v36, %v880_v34  ;;  %v2811_v31 = vpack.c.bf16 %v921_v23, %v915_v41  ;;  %v927_v34 = vld [vmem:[#allocation8 + $0xb00] sm:$0xff]  ;;  %v933_v36 = vld [vmem:[#allocation8 + $0xb30] sm:$0xff] }
 0x320   :  { %v1856_v41 = vld [vmem:[#allocation11 + $0xb0] sm:$0xff]  ;;  %v1857_v23 = vld [vmem:[#allocation11 + $0xb8] sm:$0xff] }
 0x321   :  { %2780 = vmatpush1.bf16.msra.mxu1 %v2779_v45  ;;  %v1099_v45 = vld [vmem:[#allocation8 + $0x1060] sm:$0xff] }
 0x322   :  { %2660 = vmatpush1.bf16.msra.mxu0 %v2659_v46  ;;  %2782 = vmatprep.subr.bf16.mxu1 %v2781_v47  ;;  %v892_v46 = vld [vmem:[#allocation8 + $0x9e8] sm:$0xff]  ;;  %v898_v47 = vld [vmem:[#allocation8 + $0xa18] sm:$0xff] }
 0x323   :  { %2662 = vmatprep.subr.bf16.mxu0 %v2661_v52  ;;  %v2679_v52 = vpack.c.bf16 %v1099_v45, %v1093_v44  ;;  %v2801_v0 = vpack.c.bf16 %v898_v47, %v892_v46  ;;  %v2815_v44 = vpack.c.bf16 %v933_v36, %v927_v34  ;;  %v939_v46 = vld [vmem:[#allocation8 + $0xb60] sm:$0xff]  ;;  %v945_v47 = vld [vmem:[#allocation8 + $0xb90] sm:$0xff] }
 0x324   :  { %v1858_v34 = vld [vmem:[#allocation11 + $0xc0] sm:$0xff]  ;;  %v1859_v36 = vld [vmem:[#allocation11 + $0xc8] sm:$0xff] }
 0x325   :  { %2784 = vmatpush1.bf16.msra.mxu1 %v2783_v57  ;;  %v1111_v57 = vld [vmem:[#allocation8 + $0x10c0] sm:$0xff] }
 0x326   :  { %2664 = vmatpush1.bf16.msra.mxu0 %v2663_v58  ;;  %2786 = vmatprep.subr.bf16.mxu1 %v2785_v59  ;;  %v904_v58 = vld [vmem:[#allocation8 + $0xa48] sm:$0xff]  ;;  %v910_v59 = vld [vmem:[#allocation8 + $0xa78] sm:$0xff] }
 0x327   :  { %2666 = vmatprep.subr.bf16.mxu0 %v2665_v1  ;;  %v2683_v1 = vpack.c.bf16 %v1111_v57, %v1105_v55  ;;  %v2805_v5 = vpack.c.bf16 %v910_v59, %v904_v58  ;;  %v2819_v55 = vpack.c.bf16 %v945_v47, %v939_v46  ;;  %v951_v57 = vld [vmem:[#allocation8 + $0xbc0] sm:$0xff]  ;;  %v957_v58 = vld [vmem:[#allocation8 + $0xbf0] sm:$0xff]  ;;  %v964_v59 = vld [vmem:[#allocation8 + $0xc28] sm:$0xff] }
 0x328   :  { %v1860_v46 = vld [vmem:[#allocation11 + $0xd0] sm:$0xff] }
 0x329   :  { %2788 = vmatpush1.bf16.msra.mxu1 %v2787_v12  ;;  %v1123_v12 = vld [vmem:[#allocation8 + $0x1120] sm:$0xff] }
 0x32a   :  { %2668 = vmatpush1.bf16.msra.mxu0 %v2667_v14  ;;  %2790 = vmatprep.subr.bf16.mxu1 %v2789_v15  ;;  %v916_v14 = vld [vmem:[#allocation8 + $0xaa8] sm:$0xff]  ;;  %v922_v15 = vld [vmem:[#allocation8 + $0xad8] sm:$0xff] }
 0x32b   :  { %2670 = vmatprep.subr.bf16.mxu0 %v2669_v17  ;;  %v2687_v17 = vpack.c.bf16 %v1123_v12, %v1117_v8  ;;  %v2809_v22 = vpack.c.bf16 %v922_v15, %v916_v14  ;;  %v2823_v8 = vpack.c.bf16 %v957_v58, %v951_v57  ;;  %v963_v12 = vld [vmem:[#allocation8 + $0xc20] sm:$0xff]  ;;  %v969_v14 = vld [vmem:[#allocation8 + $0xc50] sm:$0xff]  ;;  %v976_v15 = vld [vmem:[#allocation8 + $0xc88] sm:$0xff] }
 0x32c   :  { %v1863_v57 = vld [vmem:[#allocation11 + $0xe8] sm:$0xff] }
 0x32d   :  { %2792 = vmatpush1.bf16.msra.mxu1 %v2791_v26  ;;  %v1135_v26 = vld [vmem:[#allocation8 + $0x1180] sm:$0xff] }
 0x32e   :  { %2672 = vmatpush1.bf16.msra.mxu0 %v2671_v27  ;;  %2794 = vmatprep.subr.bf16.mxu1 %v2793_v28  ;;  %v928_v27 = vld [vmem:[#allocation8 + $0xb08] sm:$0xff]  ;;  %v934_v28 = vld [vmem:[#allocation8 + $0xb38] sm:$0xff] }
 0x32f   :  { %2674 = vmatprep.subr.bf16.mxu0 %v2673_v32  ;;  %v2691_v32 = vpack.c.bf16 %v1135_v26, %v1129_v24  ;;  %v2813_v33 = vpack.c.bf16 %v934_v28, %v928_v27  ;;  %v2827_v24 = vpack.c.bf16 %v969_v14, %v963_v12  ;;  %v975_v26 = vld [vmem:[#allocation8 + $0xc80] sm:$0xff]  ;;  %v981_v27 = vld [vmem:[#allocation8 + $0xcb0] sm:$0xff]  ;;  %v988_v28 = vld [vmem:[#allocation8 + $0xce8] sm:$0xff] }
 0x330   :  { %v1864_v14 = vld [vmem:[#allocation11 + $0xf0] sm:$0xff] }
 0x331   :  { %2796 = vmatpush1.bf16.msra.mxu1 %v2795_v40  ;;  %v1147_v40 = vld [vmem:[#allocation8 + $0x11e0] sm:$0xff] }
 0x332   :  { %2676 = vmatpush1.bf16.msra.mxu0 %v2675_v48  ;;  %2798 = vmatprep.subr.bf16.mxu1 %v2797_v39  ;;  %v940_v48 = vld [vmem:[#allocation8 + $0xb68] sm:$0xff]  ;;  %v946_v39 = vld [vmem:[#allocation8 + $0xb98] sm:$0xff] }
 0x333   :  { %2678 = vmatprep.subr.bf16.mxu0 %v2677_v19  ;;  %v2695_v19 = vpack.c.bf16 %v1147_v40, %v1141_v37  ;;  %v2817_v45 = vpack.c.bf16 %v946_v39, %v940_v48  ;;  %v2831_v37 = vpack.c.bf16 %v981_v27, %v975_v26  ;;  %v987_v40 = vld [vmem:[#allocation8 + $0xce0] sm:$0xff]  ;;  %v993_v48 = vld [vmem:[#allocation8 + $0xd10] sm:$0xff]  ;;  %v1000_v39 = vld [vmem:[#allocation8 + $0xd48] sm:$0xff] }
 0x334   :  { %v2835_v47 = vpack.c.bf16 %v993_v48, %v987_v40  ;;  %v1849_v26 = vld [vmem:[#allocation11 + $0x78] sm:$0xff]  ;;  %v1882_v27 = vld [vmem:[#allocation11 + $0x180] sm:$0xff] }
 0x335   :  { %2800 = vmatpush1.bf16.msra.mxu1 %v2799_v51  ;;  %v2889_v51 = vpack.c.bf16 %v1851_v43, %v1850_v42  ;;  %v1006_v43 = vld [vmem:[#allocation8 + $0xd78] sm:$0xff]  ;;  %v1047_v48 = vld [vmem:[#allocation8 + $0xec0] sm:$0xff] }
 0x336   :  { %2680 = vmatpush1.bf16.msra.mxu0 %v2679_v52  ;;  %2802 = vmatprep.subr.bf16.mxu1 %v2801_v0  ;;  %v1834_v52 = vld [vmem:[#allocation11] sm:$0xff]  ;;  %v1835_v0 = vld [vmem:[#allocation11 + $0x8] sm:$0xff] }
 0x337   :  { %2682 = vmatprep.subr.bf16.mxu0 %v2681_v56  ;;  %v2821_v56 = vpack.c.bf16 %v958_v50, %v952_v49  ;;  %v2891_v61 = vpack.c.bf16 %v1835_v0, %v1834_v52  ;;  %v2837_v49 = vpack.c.bf16 %v1006_v43, %v1000_v39  ;;  %v1005_v50 = vld [vmem:[#allocation8 + $0xd70] sm:$0xff]  ;;  %v1018_v0 = vld [vmem:[#allocation8 + $0xdd8] sm:$0xff] }
 0x338   :  { %v1053_v39 = vld [vmem:[#allocation8 + $0xef0] sm:$0xff]  ;;  %v1066_v43 = vld [vmem:[#allocation8 + $0xf58] sm:$0xff] }
 0x339   :  { %2804 = vmatpush1.bf16.msra.mxu1 %v2803_v63  ;;  %v2893_v63 = vpack.c.bf16 %v1853_v54, %v1852_v53  ;;  %v1844_v54 = vld [vmem:[#allocation11 + $0x50] sm:$0xff] }
 0x33a   :  { %2684 = vmatpush1.bf16.msra.mxu0 %v2683_v1  ;;  %2806 = vmatprep.subr.bf16.mxu1 %v2805_v5  ;;  %v1836_v1 = vld [vmem:[#allocation11 + $0x10] sm:$0xff]  ;;  %v1837_v5 = vld [vmem:[#allocation11 + $0x18] sm:$0xff] }
 0x33b   :  { %2686 = vmatprep.subr.bf16.mxu0 %v2685_v10  ;;  %v2825_v10 = vpack.c.bf16 %v970_v62, %v964_v59  ;;  %v2895_v18 = vpack.c.bf16 %v1837_v5, %v1836_v1  ;;  %v1017_v62 = vld [vmem:[#allocation8 + $0xdd0] sm:$0xff] }
 0x33d   :  { %2808 = vmatpush1.bf16.msra.mxu1 %v2807_v21  ;;  %v2897_v21 = vpack.c.bf16 %v1855_v7, %v1854_v6  ;;  %v1030_v6 = vld [vmem:[#allocation8 + $0xe38] sm:$0xff] }
 0x33e   :  { %2688 = vmatpush1.bf16.msra.mxu0 %v2687_v17  ;;  %2810 = vmatprep.subr.bf16.mxu1 %v2809_v22  ;;  %v1838_v17 = vld [vmem:[#allocation11 + $0x20] sm:$0xff]  ;;  %v1839_v22 = vld [vmem:[#allocation11 + $0x28] sm:$0xff] }
 0x33f   :  { %2690 = vmatprep.subr.bf16.mxu0 %v2689_v25  ;;  %v2829_v25 = vpack.c.bf16 %v982_v20, %v976_v15  ;;  %v2899_v29 = vpack.c.bf16 %v1839_v22, %v1838_v17  ;;  %v1865_v15 = vld [vmem:[#allocation11 + $0xf8] sm:$0xff]  ;;  %v1029_v17 = vld [vmem:[#allocation8 + $0xe30] sm:$0xff]  ;;  %v1036_v22 = vld [vmem:[#allocation8 + $0xe68] sm:$0xff] }
 0x341   :  { %2812 = vmatpush1.bf16.msra.mxu1 %v2811_v31  ;;  %v2901_v31 = vpack.c.bf16 %v1857_v23, %v1856_v41  ;;  %v1042_v23 = vld [vmem:[#allocation8 + $0xe98] sm:$0xff] }
 0x342   :  { %2692 = vmatpush1.bf16.msra.mxu0 %v2691_v32  ;;  %2814 = vmatprep.subr.bf16.mxu1 %v2813_v33  ;;  %v1840_v32 = vld [vmem:[#allocation11 + $0x30] sm:$0xff]  ;;  %v1841_v33 = vld [vmem:[#allocation11 + $0x38] sm:$0xff] }
 0x343   :  { %2694 = vmatprep.subr.bf16.mxu0 %v2693_v38  ;;  %v2833_v38 = vpack.c.bf16 %v994_v30, %v988_v28  ;;  %v2903_v42 = vpack.c.bf16 %v1841_v33, %v1840_v32  ;;  %v1883_v28 = vld [vmem:[#allocation11 + $0x188] sm:$0xff]  ;;  %v2849_v30 = vpack.c.bf16 %v1042_v23, %v1036_v22  ;;  %v1138_v23 = vld [vmem:[#allocation8 + $0x1198] sm:$0xff] }
 0x344   :  { %v1041_v32 = vld [vmem:[#allocation8 + $0xe90] sm:$0xff] }
 0x345   :  { %2816 = vmatpush1.bf16.msra.mxu1 %v2815_v44  ;;  %v2905_v44 = vpack.c.bf16 %v1859_v36, %v1858_v34  ;;  %v1048_v34 = vld [vmem:[#allocation8 + $0xec8] sm:$0xff]  ;;  %v1054_v36 = vld [vmem:[#allocation8 + $0xef8] sm:$0xff]  ;;  %v1125_v22 = vld [vmem:[#allocation8 + $0x1130] sm:$0xff] }
 0x346   :  { %2696 = vmatpush1.bf16.msra.mxu0 %v2695_v19  ;;  %2818 = vmatprep.subr.bf16.mxu1 %v2817_v45  ;;  %v1842_v19 = vld [vmem:[#allocation11 + $0x40] sm:$0xff]  ;;  %v1843_v45 = vld [vmem:[#allocation11 + $0x48] sm:$0xff]  ;;  %v2853_v40 = vpack.c.bf16 %v1054_v36, %v1048_v34  ;;  %v3464_v36 = vld [vmem:[#allocation10] sm:$0x3f] }
 0x347   :  { %2890 = vmatprep.subr.bf16.mxu0 %v2889_v51  ;;  %v1012_v51 = vld [vmem:[#allocation8 + $0xda8] sm:$0xff]  ;;  %v2907_v52 = vpack.c.bf16 %v1843_v45, %v1842_v19  ;;  %v1059_v45 = vld [vmem:[#allocation8 + $0xf20] sm:$0xff] }
 0x348   :  { %v2841_v59 = vpack.c.bf16 %v1018_v0, %v1012_v51  ;;  %v1077_v51 = vld [vmem:[#allocation8 + $0xfb0] sm:$0xff]  ;;  %v1090_v0 = vld [vmem:[#allocation8 + $0x1018] sm:$0xff] }
 0x349   :  { %1603 = vmatmul.mubr.f32.vlgmr.msra.gmra.mrb[2].mxu0 %v3443_v60  ;;  %2820 = vmatpush1.bf16.msra.mxu1 %v2819_v55  ;;  %v1845_v55 = vld [vmem:[#allocation11 + $0x58] sm:$0xff] }
 0x34a   :  { %2822 = vmatprep.subr.bf16.mxu1 %v2821_v56  ;;  %2892 = vmatpush3.bf16.msra.mxu0 %v2891_v61  ;;  %v1862_v56 = vld [vmem:[#allocation11 + $0xe0] sm:$0xff]  ;;  %v2911_v1 = vpack.c.bf16 %v1845_v55, %v1844_v54 }
 0x34b   :  { %2894 = vmatprep.subr.bf16.mxu0 %v2893_v63  ;;  %v1011_v61 = vld [vmem:[#allocation8 + $0xda0] sm:$0xff]  ;;  %v1024_v63 = vld [vmem:[#allocation8 + $0xe08] sm:$0xff]  ;;  %v2913_v7 = vpack.c.bf16 %v1863_v57, %v1862_v56  ;;  %v1089_v56 = vld [vmem:[#allocation8 + $0x1010] sm:$0xff] }
 0x34c   :  { %v2845_v20 = vpack.c.bf16 %v1030_v6, %v1024_v63  ;;  %v1083_v55 = vld [vmem:[#allocation8 + $0xfe0] sm:$0xff]  ;;  %v1096_v57 = vld [vmem:[#allocation8 + $0x1048] sm:$0xff]  ;;  %v1101_v63 = vld [vmem:[#allocation8 + $0x1070] sm:$0xff] }
 0x34d   :  { %2824 = vmatpush1.bf16.msra.mxu1 %v2823_v8  ;;  %v1846_v8 = vld [vmem:[#allocation11 + $0x60] sm:$0xff]  ;;  %v1114_v6 = vld [vmem:[#allocation8 + $0x10d8] sm:$0xff] }
 0x34e   :  { %2826 = vmatprep.subr.bf16.mxu1 %v2825_v10  ;;  %2896 = vmatpush3.bf16.msra.mxu0 %v2895_v18  ;;  %v1847_v10 = vld [vmem:[#allocation11 + $0x68] sm:$0xff]  ;;  %v2843_v18 = vpack.c.bf16 %v1017_v62, %v1011_v61  ;;  %v1095_v62 = vld [vmem:[#allocation8 + $0x1040] sm:$0xff] }
 0x34f   :  { %2898 = vmatprep.subr.bf16.mxu0 %v2897_v21  ;;  %v1023_v21 = vld [vmem:[#allocation8 + $0xe00] sm:$0xff]  ;;  %v2915_v41 = vpack.c.bf16 %v1847_v10, %v1846_v8 }
 0x350   :  { %1745 = vmatmul.mubr.f32.vlgmr.msra.gmra.mrb[8].mxu1 %v3437_v35  ;;  %v1861_v35 = vld [vmem:[#allocation11 + $0xd8] sm:$0xff] }
 0x351   :  { %2828 = vmatpush1.bf16.msra.mxu1 %v2827_v24  ;;  %1815 = vmatprep.mubr.f32.mxu1 %v3445_v4  ;;  %v999_v4 = vld [vmem:[#allocation8 + $0xd40] sm:$0xff]  ;;  %v2909_v53 = vpack.c.bf16 %v1861_v35, %v1860_v46  ;;  %v2917_v24 = vpack.c.bf16 %v1865_v15, %v1864_v14  ;;  %v1065_v46 = vld [vmem:[#allocation8 + $0xf50] sm:$0xff]  ;;  %v1072_v35 = vld [vmem:[#allocation8 + $0xf88] sm:$0xff] }
 0x352   :  { %2830 = vmatprep.subr.bf16.mxu1 %v2829_v25  ;;  %2900 = vmatpush3.bf16.msra.mxu0 %v2899_v29  ;;  %v2839_v58 = vpack.c.bf16 %v1005_v50, %v999_v4  ;;  %v1848_v25 = vld [vmem:[#allocation11 + $0x70] sm:$0xff]  ;;  %v2847_v29 = vpack.c.bf16 %v1029_v17, %v1023_v21  ;;  %v1071_v50 = vld [vmem:[#allocation8 + $0xf80] sm:$0xff]  ;;  %v1120_v15 = vld [vmem:[#allocation8 + $0x1108] sm:$0xff] }
 0x353   :  { %2902 = vmatprep.subr.bf16.mxu0 %v2901_v31  ;;  %v1035_v31 = vld [vmem:[#allocation8 + $0xe60] sm:$0xff]  ;;  %v2919_v33 = vpack.c.bf16 %v1849_v26, %v1848_v25  ;;  %v1113_v14 = vld [vmem:[#allocation8 + $0x10d0] sm:$0xff] }
 0x354   :  { %v1107_v10 = vld [vmem:[#allocation8 + $0x10a0] sm:$0xff] }
 0x355   :  { %2832 = vmatpush1.bf16.msra.mxu1 %v2831_v37  ;;  %v2921_v37 = vpack.c.bf16 %v1883_v28, %v1882_v27  ;;  %v1119_v17 = vld [vmem:[#allocation8 + $0x1100] sm:$0xff]  ;;  %v1137_v27 = vld [vmem:[#allocation8 + $0x1190] sm:$0xff]  ;;  %v1144_v28 = vld [vmem:[#allocation8 + $0x11c8] sm:$0xff] }
 0x356   :  { %2834 = vmatprep.subr.bf16.mxu1 %v2833_v38  ;;  %2904 = vmatpush3.bf16.msra.mxu0 %v2903_v42  ;;  %v2851_v38 = vpack.c.bf16 %v1041_v32, %v1035_v31  ;;  %v1060_v42 = vld [vmem:[#allocation8 + $0xf28] sm:$0xff]  ;;  %v1131_v26 = vld [vmem:[#allocation8 + $0x1160] sm:$0xff] }
 0x357   :  { %2906 = vmatprep.subr.bf16.mxu0 %v2905_v44  ;;  %v2855_v44 = vpack.c.bf16 %v1053_v39, %v1047_v48  ;;  %v2857_v19 = vpack.c.bf16 %v1066_v43, %v1060_v42  ;;  %v1143_v32 = vld [vmem:[#allocation8 + $0x11c0] sm:$0xff] }
 0x359   :  { %2836 = vmatpush1.bf16.msra.mxu1 %v2835_v47  ;;  %v1078_v47 = vld [vmem:[#allocation8 + $0xfb8] sm:$0xff] }
 0x35a   :  { %2838 = vmatprep.subr.bf16.mxu1 %v2837_v49  ;;  %2908 = vmatpush3.bf16.msra.mxu0 %v2907_v52  ;;  %v2859_v49 = vpack.c.bf16 %v1065_v46, %v1059_v45  ;;  %v2861_v4 = vpack.c.bf16 %v1078_v47, %v1072_v35  ;;  %v1084_v52 = vld [vmem:[#allocation8 + $0xfe8] sm:$0xff]  ;;  %v1884_v45 = vld [vmem:[#allocation11 + $0x190] sm:$0xff]  ;;  %v1885_v46 = vld [vmem:[#allocation11 + $0x198] sm:$0xff] }
 0x35b   :  { %v3459_v5 = vpop.f32.mrb[0].mxu0  ;;  %2910 = vmatprep.subr.bf16.mxu0 %v2909_v53  ;;  %v2863_v53 = vpack.c.bf16 %v1077_v51, %v1071_v50  ;;  %v2865_v54 = vpack.c.bf16 %v1090_v0, %v1084_v52  ;;  %v1870_v52 = vld [vmem:[#allocation11 + $0x120] sm:$0xff]  ;;  %v1871_v0 = vld [vmem:[#allocation11 + $0x128] sm:$0xff] }
 0x35c   :  { %v3461_v12 = vpop.f32.mrb[1].mxu0 }
 0x35d   :  { %2840 = vmatpush1.bf16.msra.mxu1 %v2839_v58  ;;  %v1102_v58 = vld [vmem:[#allocation8 + $0x1078] sm:$0xff] }
 0x35e   :  { %2842 = vmatprep.subr.bf16.mxu1 %v2841_v59  ;;  %2912 = vmatpush3.bf16.msra.mxu0 %v2911_v1  ;;  %v2867_v59 = vpack.c.bf16 %v1089_v56, %v1083_v55  ;;  %v2869_v61 = vpack.c.bf16 %v1102_v58, %v1096_v57  ;;  %v1108_v1 = vld [vmem:[#allocation8 + $0x10a8] sm:$0xff]  ;;  %v2931_v55 = vpack.c.bf16 %v1871_v0, %v1870_v52  ;;  %v1872_v57 = vld [vmem:[#allocation11 + $0x130] sm:$0xff]  ;;  %v1873_v58 = vld [vmem:[#allocation11 + $0x138] sm:$0xff] }
 0x35f   :  { %2914 = vmatprep.subr.bf16.mxu0 %v2913_v7  ;;  %v2871_v7 = vpack.c.bf16 %v1101_v63, %v1095_v62  ;;  %v2873_v8 = vpack.c.bf16 %v1114_v6, %v1108_v1  ;;  %v2935_v62 = vpack.c.bf16 %v1873_v58, %v1872_v57  ;;  %v1874_v1 = vld [vmem:[#allocation11 + $0x140] sm:$0xff]  ;;  %v1875_v6 = vld [vmem:[#allocation11 + $0x148] sm:$0xff]  ;;  %v1904_v0 = vld [vmem:[#allocation11 + $0x230] sm:$0xff] }
 0x360   :  { %v1906_v58 = vld [vmem:[#allocation11 + $0x240] sm:$0xff] }
 0x361   :  { %2844 = vmatpush1.bf16.msra.mxu1 %v2843_v18  ;;  %v1126_v18 = vld [vmem:[#allocation8 + $0x1138] sm:$0xff] }
 0x362   :  { %2846 = vmatprep.subr.bf16.mxu1 %v2845_v20  ;;  %2916 = vmatpush3.bf16.msra.mxu0 %v2915_v41  ;;  %v2875_v20 = vpack.c.bf16 %v1113_v14, %v1107_v10  ;;  %v2877_v21 = vpack.c.bf16 %v1126_v18, %v1120_v15  ;;  %v1132_v41 = vld [vmem:[#allocation8 + $0x1168] sm:$0xff]  ;;  %v2939_v10 = vpack.c.bf16 %v1875_v6, %v1874_v1  ;;  %v1876_v15 = vld [vmem:[#allocation11 + $0x150] sm:$0xff]  ;;  %v1877_v18 = vld [vmem:[#allocation11 + $0x158] sm:$0xff] }
 0x363   :  { %2918 = vmatprep.subr.bf16.mxu0 %v2917_v24  ;;  %v2879_v24 = vpack.c.bf16 %v1125_v22, %v1119_v17  ;;  %v2881_v25 = vpack.c.bf16 %v1138_v23, %v1132_v41  ;;  %v2943_v17 = vpack.c.bf16 %v1877_v18, %v1876_v15  ;;  %v1878_v41 = vld [vmem:[#allocation11 + $0x160] sm:$0xff]  ;;  %v1879_v23 = vld [vmem:[#allocation11 + $0x168] sm:$0xff]  ;;  %v1908_v6 = vld [vmem:[#allocation11 + $0x250] sm:$0xff] }
 0x364   :  { %v1910_v18 = vld [vmem:[#allocation11 + $0x260] sm:$0xff] }
 0x365   :  { %2848 = vmatpush1.bf16.msra.mxu1 %v2847_v29  ;;  %v1150_v29 = vld [vmem:[#allocation8 + $0x11f8] sm:$0xff] }
 0x366   :  { %2850 = vmatprep.subr.bf16.mxu1 %v2849_v30  ;;  %2920 = vmatpush3.bf16.msra.mxu0 %v2919_v33  ;;  %v2883_v30 = vpack.c.bf16 %v1137_v27, %v1131_v26  ;;  %v2885_v31 = vpack.c.bf16 %v1150_v29, %v1144_v28  ;;  %v1149_v33 = vld [vmem:[#allocation8 + $0x11f0] sm:$0xff]  ;;  %v2947_v26 = vpack.c.bf16 %v1879_v23, %v1878_v41  ;;  %v1881_v29 = vld [vmem:[#allocation11 + $0x178] sm:$0xff] }
 0x367   :  { %2922 = vmatprep.subr.bf16.mxu0 %v2921_v37  ;;  %v2887_v34 = vpack.c.bf16 %v1149_v33, %v1143_v32  ;;  %v1156_v37 = vrot.slane %v3464_v36, %v3406_v16  ;;  %v1880_v28 = vld [vmem:[#allocation11 + $0x170] sm:$0xff] }
 0x368   :  { %v2951_v32 = vpack.c.bf16 %v1881_v29, %v1880_v28  ;;  %v1912_v23 = vld [vmem:[#allocation11 + $0x270] sm:$0xff] }
 0x369   :  { %2852 = vmatpush1.bf16.msra.mxu1 %v2851_v38  ;;  %v1160_v38 = vrot.slane %v3464_v36, %v3391_v2  ;;  %v1868_v2 = vld [vmem:[#allocation11 + $0x110] sm:$0xff] }
 0x36a   :  { %2854 = vmatprep.subr.bf16.mxu1 %v2853_v40  ;;  %v1250_v40 = vadd.f32 %v3459_v5, %v1156_v37  ;;  %v1886_v5 = vld [vmem:[#allocation11 + $0x1a0] sm:$0xff]  ;;  %v1168_v37 = vrot.slane %v3464_v36, %v3397_v9 }
 0x36b   :  { %v1252_v48 = vadd.f32 %v3461_v12, %v1160_v38  ;;  %v1887_v12 = vld [vmem:[#allocation11 + $0x1a8] sm:$0xff]  ;;  %v1918_v9 = vld [vmem:[#allocation11 + $0x2a0] sm:$0xff] }
 0x36c   :  { %v2929_v51 = vpack.c.bf16 %v1887_v12, %v1886_v5  ;;  %v1903_v5 = vld [vmem:[#allocation11 + $0x228] sm:$0xff]  ;;  %v1920_v12 = vld [vmem:[#allocation11 + $0x2b0] sm:$0xff] }
 0x36d   :  { %2856 = vmatpush1.bf16.msra.mxu1 %v2855_v44 }
 0x36e   :  { %2858 = vmatprep.subr.bf16.mxu1 %v2857_v19  ;;  %v1866_v19 = vld [vmem:[#allocation11 + $0x100] sm:$0xff] }
 0x371   :  { %2860 = vmatpush1.bf16.msra.mxu1 %v2859_v49  ;;  %v2925_v49 = vpack.c.bf16 %v1885_v46, %v1884_v45 }
 0x372   :  { %2862 = vmatprep.subr.bf16.mxu1 %v2861_v4  ;;  %v1869_v4 = vld [vmem:[#allocation11 + $0x118] sm:$0xff] }
 0x373   :  { %v2927_v50 = vpack.c.bf16 %v1869_v4, %v1868_v2  ;;  %v1902_v4 = vld [vmem:[#allocation11 + $0x220] sm:$0xff] }
 0x375   :  { %2864 = vmatpush1.bf16.msra.mxu1 %v2863_v53  ;;  %v1888_v53 = vld [vmem:[#allocation11 + $0x1b0] sm:$0xff] }
 0x376   :  { %2866 = vmatprep.subr.bf16.mxu1 %v2865_v54  ;;  %v1889_v54 = vld [vmem:[#allocation11 + $0x1b8] sm:$0xff] }
 0x377   :  { %v2933_v56 = vpack.c.bf16 %v1889_v54, %v1888_v53  ;;  %v1905_v53 = vld [vmem:[#allocation11 + $0x238] sm:$0xff]  ;;  %v1922_v54 = vld [vmem:[#allocation11 + $0x2c0] sm:$0xff] }
 0x379   :  { %2868 = vmatpush1.bf16.msra.mxu1 %v2867_v59  ;;  %v1890_v59 = vld [vmem:[#allocation11 + $0x1c0] sm:$0xff] }
 0x37a   :  { %2870 = vmatprep.subr.bf16.mxu1 %v2869_v61  ;;  %v1891_v61 = vld [vmem:[#allocation11 + $0x1c8] sm:$0xff] }
 0x37b   :  { %v2937_v63 = vpack.c.bf16 %v1891_v61, %v1890_v59  ;;  %v1907_v59 = vld [vmem:[#allocation11 + $0x248] sm:$0xff]  ;;  %v1924_v61 = vld [vmem:[#allocation11 + $0x2d0] sm:$0xff] }
 0x37d   :  { %2872 = vmatpush1.bf16.msra.mxu1 %v2871_v7  ;;  %v1892_v7 = vld [vmem:[#allocation11 + $0x1d0] sm:$0xff] }
 0x37e   :  { %2874 = vmatprep.subr.bf16.mxu1 %v2873_v8  ;;  %v1893_v8 = vld [vmem:[#allocation11 + $0x1d8] sm:$0xff] }
 0x37f   :  { %v2941_v14 = vpack.c.bf16 %v1893_v8, %v1892_v7  ;;  %v1909_v7 = vld [vmem:[#allocation11 + $0x258] sm:$0xff]  ;;  %v1926_v8 = vld [vmem:[#allocation11 + $0x2e0] sm:$0xff] }
 0x381   :  { %2876 = vmatpush1.bf16.msra.mxu1 %v2875_v20  ;;  %v1894_v20 = vld [vmem:[#allocation11 + $0x1e0] sm:$0xff] }
 0x382   :  { %2878 = vmatprep.subr.bf16.mxu1 %v2877_v21  ;;  %v1895_v21 = vld [vmem:[#allocation11 + $0x1e8] sm:$0xff] }
 0x383   :  { %v2945_v22 = vpack.c.bf16 %v1895_v21, %v1894_v20  ;;  %v1911_v20 = vld [vmem:[#allocation11 + $0x268] sm:$0xff]  ;;  %v1928_v21 = vld [vmem:[#allocation11 + $0x2f0] sm:$0xff] }
 0x385   :  { %2880 = vmatpush1.bf16.msra.mxu1 %v2879_v24  ;;  %v1896_v24 = vld [vmem:[#allocation11 + $0x1f0] sm:$0xff] }
 0x386   :  { %2882 = vmatprep.subr.bf16.mxu1 %v2881_v25  ;;  %v1897_v25 = vld [vmem:[#allocation11 + $0x1f8] sm:$0xff] }
 0x387   :  { %v2949_v27 = vpack.c.bf16 %v1897_v25, %v1896_v24  ;;  %v1913_v24 = vld [vmem:[#allocation11 + $0x278] sm:$0xff] }
 0x388   :  { %v2983_v25 = vpack.c.bf16 %v1913_v24, %v1912_v23 }
 0x389   :  { %2884 = vmatpush1.bf16.msra.mxu1 %v2883_v30  ;;  %v1914_v30 = vld [vmem:[#allocation11 + $0x280] sm:$0xff] }
 0x38a   :  { %2886 = vmatprep.subr.bf16.mxu1 %v2885_v31  ;;  %v1915_v31 = vld [vmem:[#allocation11 + $0x288] sm:$0xff] }
 0x38b   :  { %v2953_v33 = vpack.c.bf16 %v1915_v31, %v1914_v30 }
 0x38d   :  { %2888 = vmatpush1.bf16.msra.mxu1 %v2887_v34  ;;  %v1164_v34 = vrot.slane %v3464_v36, %v3393_v3  ;;  %v1901_v3 = vld [vmem:[#allocation11 + $0x218] sm:$0xff] }
 0x390   :  { %1816 = vmatmul.mubr.f32.vlgmr.msra.gmra.mrb[8].mxu1 %v3443_v60  ;;  %v1867_v60 = vld [vmem:[#allocation11 + $0x108] sm:$0xff] }
 0x391   :  { %v2923_v47 = vpack.c.bf16 %v1867_v60, %v1866_v19  ;;  %v1917_v19 = vld [vmem:[#allocation11 + $0x298] sm:$0xff] }
 0x3a3   :  { %v1391_v39 = vpop.f32.mrb[6].mxu1 }
 0x3a4   :  { %v2986_v42 = vadd.f32 %v1391_v39, %v1250_v40  ;;  %v1393_v43 = vpop.f32.mrb[7].mxu1 }
 0x3a5   :  { %v2988_v44 = vadd.f32 %v1393_v43, %v1252_v48  ;;  %v1899_v43 = vld [vmem:[#allocation11 + $0x208] sm:$0xff] }
 0x3a6   :  { %3019 = vtanh.f32 %v2986_v42  ;;  %v1898_v42 = vld [vmem:[#allocation11 + $0x200] sm:$0xff] }
 0x3a7   :  { %3021 = vtanh.f32 %v2988_v44  ;;  %v1916_v44 = vld [vmem:[#allocation11 + $0x290] sm:$0xff]  ;;  %v2955_v45 = vpack.c.bf16 %v1899_v43, %v1898_v42 }
 0x3b0   :  { %v3020_v35 = vpop.eup %3019 }
 0x3b1   :  { %v3022_v16 = vpop.eup %3021  ;;  %1828 = vst [vmem:[#allocation15] sm:$0xff] %v3020_v35 }
 0x3b2   :  { %1829 = vst [vmem:[#allocation15 + $0x8] sm:$0xff] %v3022_v16  ;;  %2001 = vmatprep.mubr.f32.mxu0 %v3022_v16  ;;  %v1919_v16 = vld [vmem:[#allocation11 + $0x2a8] sm:$0xff] }
 0x3b3   :  { %2002 = vmatmul.mubr.f32.vlgmr.msra.gmra.mrb[4].mxu0 %v3020_v35  ;;  %v2957_v35 = vpack.c.bf16 %v1917_v19, %v1916_v44  ;;  %v2961_v2 = vpack.c.bf16 %v1919_v16, %v1918_v9 }
 0x3b4   :  { %2924 = vmatpush3.bf16.msra.mxu0 %v2923_v47  ;;  %v1900_v47 = vld [vmem:[#allocation11 + $0x210] sm:$0xff] }
 0x3b5   :  { %2926 = vmatprep.subr.bf16.mxu0 %v2925_v49  ;;  %v2959_v49 = vpack.c.bf16 %v1901_v3, %v1900_v47 }
 0x3b8   :  { %2928 = vmatpush3.bf16.msra.mxu0 %v2927_v50  ;;  %v1921_v50 = vld [vmem:[#allocation11 + $0x2b8] sm:$0xff] }
 0x3b9   :  { %2930 = vmatprep.subr.bf16.mxu0 %v2929_v51  ;;  %v2963_v51 = vpack.c.bf16 %v1903_v5, %v1902_v4  ;;  %v2965_v52 = vpack.c.bf16 %v1921_v50, %v1920_v12 }
 0x3bc   :  { %2932 = vmatpush3.bf16.msra.mxu0 %v2931_v55  ;;  %v1923_v55 = vld [vmem:[#allocation11 + $0x2c8] sm:$0xff] }
 0x3bd   :  { %2934 = vmatprep.subr.bf16.mxu0 %v2933_v56  ;;  %v2967_v56 = vpack.c.bf16 %v1905_v53, %v1904_v0  ;;  %v2969_v57 = vpack.c.bf16 %v1923_v55, %v1922_v54 }
 0x3c0   :  { %2936 = vmatpush3.bf16.msra.mxu0 %v2935_v62  ;;  %v1925_v62 = vld [vmem:[#allocation11 + $0x2d8] sm:$0xff] }
 0x3c1   :  { %2938 = vmatprep.subr.bf16.mxu0 %v2937_v63  ;;  %v2971_v63 = vpack.c.bf16 %v1907_v59, %v1906_v58  ;;  %v2973_v1 = vpack.c.bf16 %v1925_v62, %v1924_v61 }
 0x3c4   :  { %2940 = vmatpush3.bf16.msra.mxu0 %v2939_v10  ;;  %v1927_v10 = vld [vmem:[#allocation11 + $0x2e8] sm:$0xff] }
 0x3c5   :  { %2942 = vmatprep.subr.bf16.mxu0 %v2941_v14  ;;  %v2975_v14 = vpack.c.bf16 %v1909_v7, %v1908_v6  ;;  %v2977_v15 = vpack.c.bf16 %v1927_v10, %v1926_v8 }
 0x3c8   :  { %2944 = vmatpush3.bf16.msra.mxu0 %v2943_v17  ;;  %v1929_v17 = vld [vmem:[#allocation11 + $0x2f8] sm:$0xff] }
 0x3c9   :  { %2946 = vmatprep.subr.bf16.mxu0 %v2945_v22  ;;  %v2979_v22 = vpack.c.bf16 %v1911_v20, %v1910_v18  ;;  %v2981_v41 = vpack.c.bf16 %v1929_v17, %v1928_v21 }
 0x3cc   :  { %2948 = vmatpush3.bf16.msra.mxu0 %v2947_v26  ;;  %v1172_v26 = vrot.slane %v3464_v36, %v3400_v11 }
 0x3cd   :  { %2950 = vmatprep.subr.bf16.mxu0 %v2949_v27  ;;  %v1176_v27 = vrot.slane %v3464_v36, %v3403_v13 }
 0x3d0   :  { %2952 = vmatpush3.bf16.msra.mxu0 %v2951_v32 }
 0x3d1   :  { %2954 = vmatprep.subr.bf16.mxu0 %v2953_v33 }
 0x41c   :  { %v1604_v38 = vpop.f32.mrb[2].mxu0 }
 0x41d   :  { %v2989_v40 = vadd.f32 %v1604_v38, %v1164_v34  ;;  %v1606_v48 = vpop.f32.mrb[3].mxu0 }
 0x41e   :  { %v2990_v39 = vadd.f32 %v1606_v48, %v1168_v37 }
 0x41f   :  { %3023 = vtanh.f32 %v2989_v40 }
 0x420   :  { %3025 = vtanh.f32 %v2990_v39 }
 0x429   :  { %v3024_v60 = vpop.eup %3023 }
 0x42a   :  { %v3026_v46 = vpop.eup %3025  ;;  %1830 = vst [vmem:[#allocation15 + $0x10] sm:$0xff] %v3024_v60 }
 0x42b   :  { %1831 = vst [vmem:[#allocation15 + $0x18] sm:$0xff] %v3026_v46  ;;  %2071 = vmatprep.mubr.f32.mxu0 %v3026_v46 }
 0x42c   :  { %2072 = vmatmul.mubr.f32.vlgmr.msra.gmra.mrb[6].mxu0 %v3024_v60 }
 0x42d   :  { %2956 = vmatpush3.bf16.msra.mxu0 %v2955_v45 }
 0x42e   :  { %2958 = vmatprep.subr.bf16.mxu0 %v2957_v35 }
 0x431   :  { %2960 = vmatpush3.bf16.msra.mxu0 %v2959_v49 }
 0x432   :  { %2962 = vmatprep.subr.bf16.mxu0 %v2961_v2 }
 0x435   :  { %2964 = vmatpush3.bf16.msra.mxu0 %v2963_v51 }
 0x436   :  { %2966 = vmatprep.subr.bf16.mxu0 %v2965_v52 }
 0x439   :  { %2968 = vmatpush3.bf16.msra.mxu0 %v2967_v56 }
 0x43a   :  { %2970 = vmatprep.subr.bf16.mxu0 %v2969_v57 }
 0x43d   :  { %2972 = vmatpush3.bf16.msra.mxu0 %v2971_v63 }
 0x43e   :  { %2974 = vmatprep.subr.bf16.mxu0 %v2973_v1 }
 0x441   :  { %2976 = vmatpush3.bf16.msra.mxu0 %v2975_v14 }
 0x442   :  { %2978 = vmatprep.subr.bf16.mxu0 %v2977_v15 }
 0x445   :  { %2980 = vmatpush3.bf16.msra.mxu0 %v2979_v22 }
 0x446   :  { %2982 = vmatprep.subr.bf16.mxu0 %v2981_v41 }
 0x449   :  { %2984 = vmatpush3.bf16.msra.mxu0 %v2983_v25 }
 0x463   :  { %v1817_v28 = vpop.f32.mrb[8].mxu1 }
 0x464   :  { %v2991_v29 = vadd.f32 %v1817_v28, %v1172_v26  ;;  %v1819_v30 = vpop.f32.mrb[9].mxu1 }
 0x465   :  { %v2992_v31 = vadd.f32 %v1819_v30, %v1176_v27 }
 0x466   :  { %3027 = vtanh.f32 %v2991_v29 }
 0x467   :  { %3029 = vtanh.f32 %v2992_v31 }
 0x470   :  { %v3028_v32 = vpop.eup %3027 }
 0x471   :  { %v3030_v33 = vpop.eup %3029  ;;  %1832 = vst [vmem:[#allocation15 + $0x20] sm:$0xff] %v3028_v32 }
 0x472   :  { %1833 = vst [vmem:[#allocation15 + $0x28] sm:$0xff] %v3030_v33  ;;  %2141 = vmatprep.mubr.f32.mxu0 %v3030_v33 }
 0x473   :  { %2142 = vmatmul.mubr.f32.vlgmr.msra.gmra.mrb[8].mxu0 %v3028_v32 }
 0x486   :  { %v2216_v34 = vpop.f32.mrb[4].mxu0 }
 0x487   :  { %v2217_v37 = vpop.f32.mrb[5].mxu0 }
 0x488   :  { %v2218_v38 = vadd.f32 %v2217_v37, %v2216_v34 }
 0x489   :  { %3196 = shalt.err (!%p3193_p4)
}
 0x48a   :  { %s3197_s23 = scalar_lea.hbm %s3512_s8, 768 }
 0x48b   :  { %p3198_p5 = scmp.ne.s32.totalorder %s3512_s8, %s3197_s23  ;;  %p3201_p6 = scmp.lt.u32.totalorder %s3197_s23, %s3512_s8 }
 0x48d   :  { %p3203_p7 = pnand %p3201_p6, %p3198_p5 }
 0x48f   :  { %3206 = shalt.err (!%p3203_p7)
}
 0x490   :  { %2167 = dma.vmem_to_hbm [thread:$0]  %s2165_s19, 768, %s3512_s8, [#allocation16]   ;;  %v2183_v11 = vld [vmem:[#allocation13] ss:$0 sm:$0xff] }
 0x491   :  { %v2004_v40 = vadd.f32 %v2218_v38, %v2183_v11  ;;  %s3254_s10 = smov [#allocation14]  }
 0x492   :  { %s2154_s11 = sshll.u32 %s3254_s10, 4  ;;  %s2155_s11 = int_to_ptr.vmem [resolvable:$true] %s2154_s11 }
 0x493   :  { %s3207_s5 = scalar_lea.vmem %s2155_s11, 128  ;;  %p3212_p9 = scmp.lt.s32.totalorder %s2155_s11, %s2155_s11 }
 0x494   :  { %p3208_p8 = scmp.ne.s32.totalorder %s2155_s11, %s3207_s5  ;;  %p3213_p10 = scmp.lt.s32.totalorder %s3207_s5, %s3207_s5 }
 0x496   :  { %p3214_p11 = por %p3213_p10, %p3212_p9 }
 0x498   :  { %p3215_p12 = pnand %p3214_p11, %p3208_p8 }
 0x4ff   :  { %v2251_v13 = vpop.f32.mrb[6].mxu0 }
 0x500   :  { %v2252_v36 = vpop.f32.mrb[7].mxu0 }
 0x501   :  { %v2253_v48 = vadd.f32 %v2252_v36, %v2251_v13 }
 0x503   :  { %v2074_v39 = vadd.f32 %v2253_v48, %v2004_v40 }
 0x546   :  { %v2286_v42 = vpop.f32.mrb[8].mxu0 }
 0x547   :  { %v2287_v43 = vpop.f32.mrb[9].mxu0 }
 0x548   :  { %v2288_v44 = vadd.f32 %v2287_v43, %v2286_v42 }
 0x54a   :  { %v2144_v19 = vadd.f32 %v2288_v44, %v2074_v39 }
 0x54c   :  { %2147 = vst [vmem:[#allocation14] sm:$0xff] %v2144_v19 }
 0x54d   :  { %3218 = shalt.err (!%p3215_p12)
}
 0x54e   :  { %s3219_s28 = scalar_lea.hbm %s3511_s7, 128 }
 0x54f   :  { %p3220_p13 = scmp.ne.s32.totalorder %s3511_s7, %s3219_s28  ;;  %p3223_p0 = scmp.lt.u32.totalorder %s3219_s28, %s3511_s7 }
 0x551   :  { %p3225_p1 = pnand %p3223_p0, %p3220_p13 }
 0x553   :  { %3228 = shalt.err (!%p3225_p1)
}
 0x554   :  { %2157 = dma.vmem_to_hbm [thread:$0]  %s2155_s11, 128, %s3511_s7, [#allocation4]  }
 0x555   :  { %3237 = dma.done.wait [#allocation4], 128  }
 0x556   :  { %3238 = vsyncadd [#allocation4], 4294967168 }
 0x557   :  { %3239 = dma.done.wait [#allocation16], 768  }
 0x558   :  { %3240 = vsyncadd [#allocation16], 4294966528 }
 0x559   :  { %2174 = vsyncpa [#allocation3], 1 }
 0x55a   :  { %2175 = vsyncpa [#allocation6], 1 }
 0x55b   :  { %2176 = vsyncpa [#allocation9], 1 }
 0x55c   :  { %2177 = vsyncpa [#allocation12], 1 }
 0x55d   :  { %2178 = vsyncpa [#allocation4], 1 }
 0x55e   :  { %2179 = vsyncpa [#allocation16], 1 }

</bundles_post_ra>
